<compile_context>
chip_gen: v7x
topology: tpu7x:2x2x1
jax: 0.10.0
libtpu: 0.0.40
codegen_flags: <defaults>
</compile_context>

<pallas_src>
import math

import jax
import jax.numpy as jnp
import numpy as np
from jax import lax
from jax.experimental import pallas as pl
from jax.experimental.pallas import tpu as pltpu


def _round_up(x, n):
    return ((x + n - 1) // n) * n


def _make_kernel(*, tb, bb, din_p, d_p, d_real, m, jumps, ring_size):
    inv_scale = 1.0 / math.sqrt(float(d_real))
    mask = ring_size - 1  # ring_size is a power of two

    def kernel(x_ref, w_in_ref, b_in_ref, w_kv_ref, b_kv_ref, w_bl_ref,
               b_bl_ref, y_ref, hist_ref):
        ti = pl.program_id(1)  # time-block index (innermost, sequential)

        # h_history row 0 (initial hidden state) lives in ring slot 0.
        @pl.when(ti == 0)
        def _():
            hist_ref[0] = jnp.zeros((bb, d_p), jnp.float32)

        # Hoist weight reads and bias broadcasts out of the time loop.
        w_in = w_in_ref[...]
        w_kv = w_kv_ref[...]
        w_bl = w_bl_ref[...]
        b_in = jnp.broadcast_to(b_in_ref[...], (bb, d_p))
        b_kv = jnp.broadcast_to(b_kv_ref[...], (m * bb, 2 * d_p))
        b_bl = jnp.broadcast_to(b_bl_ref[...], (bb, d_p))

        t0 = ti * tb
        # Previous-step hidden state (jump j=0 always hops back exactly 1):
        # ring slot t0 holds it; slot 0 == zeros for the very first step.
        prev_h0 = hist_ref[t0 & mask]

        def step(i, prev_h):
            t = t0 + i
            x_t = x_ref[i]  # (bb, din_p)
            q = jnp.dot(x_t, w_in, preferred_element_type=jnp.float32) + b_in

            # Gather H at the binary backward jumps (j=0 comes from the carry).
            hs = [prev_h]
            for j in range(1, m):
                row = jnp.maximum(t + 1 - jumps[j], 0)  # clamped backward hop
                hs.append(hist_ref[row & mask])
            h_stack = jnp.concatenate(hs, axis=0)  # (m*bb, d_p)

            # One fused MXU push for K and V of all m jumps.
            kv = jnp.dot(h_stack, w_kv,
                         preferred_element_type=jnp.float32) + b_kv

            # Attention over the m jumps: online softmax, no lane-1 concat.
            ss = []
            for j in range(m):
                k_j = kv[j * bb:(j + 1) * bb, :d_p]
                ss.append(jnp.sum(q * k_j, axis=-1, keepdims=True) * inv_scale)
            s_max = ss[0]
            for j in range(1, m):
                s_max = jnp.maximum(s_max, ss[j])
            es = [jnp.exp(s - s_max) for s in ss]
            denom = es[0]
            for j in range(1, m):
                denom = denom + es[j]
            num = es[0] * kv[0:bb, d_p:]
            for j in range(1, m):
                num = num + es[j] * kv[j * bb:(j + 1) * bb, d_p:]
            rs = num * pl.reciprocal(denom, approx=True)

            h_i = jax.nn.sigmoid(q + rs)
            y_i = jax.nn.sigmoid(
                jnp.dot(h_i, w_bl, preferred_element_type=jnp.float32)
                + b_bl + h_i)

            y_ref[i] = y_i.astype(y_ref.dtype)
            hist_ref[(t + 1) & mask] = h_i  # write history ring slot
            return h_i

        lax.fori_loop(0, tb, step, prev_h0, unroll=True)

    return kernel


def binary_jumping_rnn_forward(x, params, *, m, r, time_block=8,
                               batch_block=None):
    """x: (T, B, input_dim) float32 -> y: (T, B, hidden_dim) float32."""
    T, B, Din = x.shape
    D = params["w_in"].shape[1]

    # Lane-dense padding: last dims to multiples of 128, batch to sublane x8.
    d_p = _round_up(D, 128)
    din_p = _round_up(Din, 128)
    b_p = _round_up(B, 8)

    # Time-block size (must divide T).
    tb = max(1, min(time_block, T))
    while T % tb:
        tb -= 1
    # Batch-block size (must divide padded batch; multiple of 8).
    bb = b_p if batch_block is None else _round_up(min(batch_block, b_p), 8)
    if b_p % bb:
        bb = b_p

    jumps = [r ** j for j in range(m)]  # backward_jumps = [1, r, r^2, ...]
    ring_size = pl.next_power_of_2(min(jumps[-1], T) + 1)

    def pad2(a, r0, r1):
        return jnp.pad(a, ((0, r0 - a.shape[0]), (0, r1 - a.shape[1])))

    x_p = jnp.pad(x, ((0, 0), (0, b_p - B), (0, din_p - Din)))
    w_in = pad2(params["w_in"], din_p, d_p)
    b_in = pad2(params["b_in"], 1, d_p)
    w_kv = jnp.concatenate([pad2(params["w_k"], d_p, d_p),
                            pad2(params["w_v"], d_p, d_p)], axis=1)
    b_kv = jnp.concatenate([pad2(params["b_k"], 1, d_p),
                            pad2(params["b_v"], 1, d_p)], axis=1)
    w_bl = pad2(params["w_bl"], d_p, d_p)
    b_bl = pad2(params["b_bl"], 1, d_p)

    kernel = _make_kernel(tb=tb, bb=bb, din_p=din_p, d_p=d_p, d_real=D,
                          m=m, jumps=jumps, ring_size=ring_size)

    grid = (b_p // bb, T // tb)  # (batch blocks [parallel], time blocks [seq])
    grid_spec = pltpu.PrefetchScalarGridSpec(
        num_scalar_prefetch=0,
        grid=grid,
        in_specs=[
            pl.BlockSpec((tb, bb, din_p), lambda bi, ti: (ti, bi, 0)),  # x
            pl.BlockSpec((din_p, d_p), lambda bi, ti: (0, 0)),          # W_in
            pl.BlockSpec((1, d_p), lambda bi, ti: (0, 0)),              # b_in
            pl.BlockSpec((d_p, 2 * d_p), lambda bi, ti: (0, 0)),        # [W_k|W_v]
            pl.BlockSpec((1, 2 * d_p), lambda bi, ti: (0, 0)),          # [b_k|b_v]
            pl.BlockSpec((d_p, d_p), lambda bi, ti: (0, 0)),            # W_bl
            pl.BlockSpec((1, d_p), lambda bi, ti: (0, 0)),              # b_bl
        ],
        out_specs=pl.BlockSpec((tb, bb, d_p), lambda bi, ti: (ti, bi, 0)),
        scratch_shapes=[pltpu.VMEM((ring_size, bb, d_p), jnp.float32)],
    )

    y_p = pl.pallas_call(
        kernel,
        out_shape=jax.ShapeDtypeStruct((T, b_p, d_p), jnp.float32),
        grid_spec=grid_spec,
        compiler_params=pltpu.CompilerParams(
            dimension_semantics=("parallel", "arbitrary")),
    )(x_p, w_in, b_in, w_kv, b_kv, w_bl, b_bl)

    return y_p[:, :B, :D]


def reference_forward(x, params, *, m, r):
    """Pure-JAX reference of the intended PyTorch cell semantics."""
    T, B, _ = x.shape
    D = params["w_in"].shape[1]
    scale = math.sqrt(float(D))
    hist = jnp.zeros((T + 1, B, D), jnp.float32)
    ys = []
    for t in range(T):
        q = x[t] @ params["w_in"] + params["b_in"]
        scores, vs = [], []
        for j in range(m):
            idx = max(t + 1 - r ** j, 0)
            h_j = hist[idx]
            k_j = h_j @ params["w_k"] + params["b_k"]
            v_j = h_j @ params["w_v"] + params["b_v"]
            scores.append(jnp.sum(q * k_j, axis=-1, keepdims=True) / scale)
            vs.append(v_j)
        attn = jax.nn.softmax(jnp.concatenate(scores, axis=-1), axis=-1)
        rs = sum(attn[:, j:j + 1] * vs[j] for j in range(m))
        h_i = jax.nn.sigmoid(q + rs)
        y_i = jax.nn.sigmoid(h_i @ params["w_bl"] + params["b_bl"] + h_i)
        hist = hist.at[t + 1].set(h_i)
        ys.append(y_i)
    return jnp.stack(ys, axis=0)


def init_params(key, input_dim, hidden_dim):
    ks = jax.random.split(key, 8)
    s = 0.1
    return {
        "w_in": (jax.random.normal(ks[0], (input_dim, hidden_dim)) * s).astype(jnp.float32),
        "b_in": (jax.random.normal(ks[1], (1, hidden_dim)) * s).astype(jnp.float32),
        "w_k": (jax.random.normal(ks[2], (hidden_dim, hidden_dim)) * s).astype(jnp.float32),
        "b_k": (jax.random.normal(ks[3], (1, hidden_dim)) * s).astype(jnp.float32),
        "w_v": (jax.random.normal(ks[4], (hidden_dim, hidden_dim)) * s).astype(jnp.float32),
        "b_v": (jax.random.normal(ks[5], (1, hidden_dim)) * s).astype(jnp.float32),
        "w_bl": (jax.random.normal(ks[6], (hidden_dim, hidden_dim)) * s).astype(jnp.float32),
        "b_bl": (jax.random.normal(ks[7], (1, hidden_dim)) * s).astype(jnp.float32),
    }


if __name__ == "__main__":
    # Small config: seq T=8, batch B=8, input_dim=16, hidden_dim=32, m=4, r=2.
    T, B, Din, D = 8, 8, 16, 32
    m, r = 4, 2

    key = jax.random.PRNGKey(0)
    k_x, k_p = jax.random.split(key)
    x = jax.random.normal(k_x, (T, B, Din), dtype=jnp.float32)
    params = init_params(k_p, Din, D)

    y = binary_jumping_rnn_forward(x, params, m=m, r=r, time_block=4)
    y = jax.block_until_ready(y)

    y_ref = reference_forward(x, params, m=m, r=r)
    # approx reciprocal in the softmax denominator -> slightly looser tolerance
    np.testing.assert_allclose(np.asarray(y), np.asarray(y_ref),
                               rtol=2e-3, atol=2e-3)

    print("KERNEL_OK")
</pallas_src>

<mosaic_0001>
module attributes {stable_mosaic.version = 11 : i64} {
  func.func @kernel(%arg0: i32, %arg1: i32, %arg2: memref<4x8x128xf32, #tpu.memory_space<vmem>>, %arg3: memref<128x128xf32, #tpu.memory_space<vmem>>, %arg4: memref<1x128xf32, #tpu.memory_space<vmem>>, %arg5: memref<128x256xf32, #tpu.memory_space<vmem>>, %arg6: memref<1x256xf32, #tpu.memory_space<vmem>>, %arg7: memref<128x128xf32, #tpu.memory_space<vmem>>, %arg8: memref<1x128xf32, #tpu.memory_space<vmem>>, %arg9: memref<4x8x128xf32, #tpu.memory_space<vmem>>, %arg10: memref<16x8x128xf32, #tpu.memory_space<vmem>>) attributes {dimension_semantics = [#tpu.dimension_semantics<parallel>, #tpu.dimension_semantics<arbitrary>], iteration_bounds = array<i64: 1, 2>, scalar_prefetch = 0 : i64, scratch_operands = 1 : i64, tpu.core_type = #tpu.core_type<tc>, window_params = [{transform_indices = @transform_0, window_bounds = array<i64: 4, 8, 128>}, {pipeline_mode = #tpu.pipeline_mode<synchronous>, transform_indices = @transform_1, window_bounds = array<i64: 128, 128>}, {pipeline_mode = #tpu.pipeline_mode<synchronous>, transform_indices = @transform_2, window_bounds = array<i64: 1, 128>}, {pipeline_mode = #tpu.pipeline_mode<synchronous>, transform_indices = @transform_3, window_bounds = array<i64: 128, 256>}, {pipeline_mode = #tpu.pipeline_mode<synchronous>, transform_indices = @transform_4, window_bounds = array<i64: 1, 256>}, {pipeline_mode = #tpu.pipeline_mode<synchronous>, transform_indices = @transform_5, window_bounds = array<i64: 128, 128>}, {pipeline_mode = #tpu.pipeline_mode<synchronous>, transform_indices = @transform_6, window_bounds = array<i64: 1, 128>}, {transform_indices = @transform_7, window_bounds = array<i64: 4, 8, 128>}]} {
    %c0_i32 = arith.constant 0 : i32
    %0 = arith.cmpi eq, %arg1, %c0_i32 : i32
    %1 = arith.extui %0 : i1 to i32
    %c0_i32_0 = arith.constant 0 : i32
    %2 = arith.cmpi ne, %1, %c0_i32_0 : i32
    scf.if %2 {
      %cst_170 = arith.constant 0.000000e+00 : f32
      %460 = vector.broadcast %cst_170 : f32 to vector<8x128xf32>
      %c0_171 = arith.constant 0 : index
      %c0_172 = arith.constant 0 : index
      %c0_173 = arith.constant 0 : index
      %461 = vector.load %arg10[%c0_171, %c0_172, %c0_173] : memref<16x8x128xf32, #tpu.memory_space<vmem>>, vector<1x8x128xf32>
      %462 = vector.shape_cast %461 : vector<1x8x128xf32> to vector<8x128xf32>
      %463 = vector.shape_cast %460 : vector<8x128xf32> to vector<1x8x128xf32>
      tpu.vector_store %arg10[%c0_171, %c0_172, %c0_173], %463 {strides = array<i32>} : memref<16x8x128xf32, #tpu.memory_space<vmem>>, vector<1x8x128xf32>,
    } else {
    }
    %c0 = arith.constant 0 : index
    %c0_1 = arith.constant 0 : index
    %3 = vector.load %arg3[%c0, %c0_1] : memref<128x128xf32, #tpu.memory_space<vmem>>, vector<128x128xf32>
    %c0_2 = arith.constant 0 : index
    %c0_3 = arith.constant 0 : index
    %4 = vector.load %arg5[%c0_2, %c0_3] : memref<128x256xf32, #tpu.memory_space<vmem>>, vector<128x256xf32>
    %c0_4 = arith.constant 0 : index
    %c0_5 = arith.constant 0 : index
    %5 = vector.load %arg7[%c0_4, %c0_5] : memref<128x128xf32, #tpu.memory_space<vmem>>, vector<128x128xf32>
    %c0_6 = arith.constant 0 : index
    %c0_7 = arith.constant 0 : index
    %6 = vector.load %arg4[%c0_6, %c0_7] : memref<1x128xf32, #tpu.memory_space<vmem>>, vector<1x128xf32>
    %7 = vector.shape_cast %6 : vector<1x128xf32> to vector<1x128xf32>
    %8 = vector.broadcast %7 : vector<1x128xf32> to vector<8x128xf32>
    %c0_8 = arith.constant 0 : index
    %c0_9 = arith.constant 0 : index
    %9 = vector.load %arg6[%c0_8, %c0_9] : memref<1x256xf32, #tpu.memory_space<vmem>>, vector<1x256xf32>
    %10 = vector.shape_cast %9 : vector<1x256xf32> to vector<1x256xf32>
    %11 = vector.broadcast %10 : vector<1x256xf32> to vector<32x256xf32>
    %c0_10 = arith.constant 0 : index
    %c0_11 = arith.constant 0 : index
    %12 = vector.load %arg8[%c0_10, %c0_11] : memref<1x128xf32, #tpu.memory_space<vmem>>, vector<1x128xf32>
    %13 = vector.shape_cast %12 : vector<1x128xf32> to vector<1x128xf32>
    %14 = vector.broadcast %13 : vector<1x128xf32> to vector<8x128xf32>
    %c4_i32 = arith.constant 4 : i32
    %15 = arith.muli %arg1, %c4_i32 : i32
    %c15_i32 = arith.constant 15 : i32
    %16 = arith.andi %15, %c15_i32 : i32
    %17 = arith.index_cast %16 : i32 to index
    %c0_12 = arith.constant 0 : index
    %c0_13 = arith.constant 0 : index
    %18 = vector.load %arg10[%17, %c0_12, %c0_13] : memref<16x8x128xf32, #tpu.memory_space<vmem>>, vector<1x8x128xf32>
    %19 = vector.shape_cast %18 : vector<1x8x128xf32> to vector<8x128xf32>
    %c0_i32_14 = arith.constant 0 : i32
    %20 = arith.addi %15, %c0_i32_14 : i32
    %21 = arith.index_cast %c0_i32_14 : i32 to index
    %c0_15 = arith.constant 0 : index
    %c0_16 = arith.constant 0 : index
    %22 = vector.load %arg2[%21, %c0_15, %c0_16] : memref<4x8x128xf32, #tpu.memory_space<vmem>>, vector<1x8x128xf32>
    %23 = vector.shape_cast %22 : vector<1x8x128xf32> to vector<8x128xf32>
    %cst = arith.constant dense<0.000000e+00> : vector<8x128xf32>
    %24 = tpu.matmul %23, %3, %cst {dimension_numbers = #tpu.dot_dimension_numbers<[1], [0], [0], [1], [0, 0, 1, 1], [], []>} : vector<8x128xf32>, vector<128x128xf32>, vector<8x128xf32> -> vector<8x128xf32>
    %25 = arith.addf %24, %8 : vector<8x128xf32>
    %c1_i32 = arith.constant 1 : i32
    %26 = arith.addi %20, %c1_i32 : i32
    %c2_i32 = arith.constant 2 : i32
    %27 = arith.subi %26, %c2_i32 : i32
    %c0_i32_17 = arith.constant 0 : i32
    %28 = arith.maxsi %27, %c0_i32_17 : i32
    %c15_i32_18 = arith.constant 15 : i32
    %29 = arith.andi %28, %c15_i32_18 : i32
    %30 = arith.index_cast %29 : i32 to index
    %c0_19 = arith.constant 0 : index
    %c0_20 = arith.constant 0 : index
    %31 = vector.load %arg10[%30, %c0_19, %c0_20] : memref<16x8x128xf32, #tpu.memory_space<vmem>>, vector<1x8x128xf32>
    %32 = vector.shape_cast %31 : vector<1x8x128xf32> to vector<8x128xf32>
    %c1_i32_21 = arith.constant 1 : i32
    %33 = arith.addi %20, %c1_i32_21 : i32
    %c4_i32_22 = arith.constant 4 : i32
    %34 = arith.subi %33, %c4_i32_22 : i32
    %c0_i32_23 = arith.constant 0 : i32
    %35 = arith.maxsi %34, %c0_i32_23 : i32
    %c15_i32_24 = arith.constant 15 : i32
    %36 = arith.andi %35, %c15_i32_24 : i32
    %37 = arith.index_cast %36 : i32 to index
    %c0_25 = arith.constant 0 : index
    %c0_26 = arith.constant 0 : index
    %38 = vector.load %arg10[%37, %c0_25, %c0_26] : memref<16x8x128xf32, #tpu.memory_space<vmem>>, vector<1x8x128xf32>
    %39 = vector.shape_cast %38 : vector<1x8x128xf32> to vector<8x128xf32>
    %c1_i32_27 = arith.constant 1 : i32
    %40 = arith.addi %20, %c1_i32_27 : i32
    %c8_i32 = arith.constant 8 : i32
    %41 = arith.subi %40, %c8_i32 : i32
    %c0_i32_28 = arith.constant 0 : i32
    %42 = arith.maxsi %41, %c0_i32_28 : i32
    %c15_i32_29 = arith.constant 15 : i32
    %43 = arith.andi %42, %c15_i32_29 : i32
    %44 = arith.index_cast %43 : i32 to index
    %c0_30 = arith.constant 0 : index
    %c0_31 = arith.constant 0 : index
    %45 = vector.load %arg10[%44, %c0_30, %c0_31] : memref<16x8x128xf32, #tpu.memory_space<vmem>>, vector<1x8x128xf32>
    %46 = vector.shape_cast %45 : vector<1x8x128xf32> to vector<8x128xf32>
    %47 = tpu.concatenate %19, %32, %39, %46 in 0 : vector<8x128xf32>, vector<8x128xf32>, vector<8x128xf32>, vector<8x128xf32> -> vector<32x128xf32>
    %cst_32 = arith.constant dense<0.000000e+00> : vector<32x256xf32>
    %48 = tpu.matmul %47, %4, %cst_32 {dimension_numbers = #tpu.dot_dimension_numbers<[1], [0], [0], [1], [0, 0, 1, 1], [], []>} : vector<32x128xf32>, vector<128x256xf32>, vector<32x256xf32> -> vector<32x256xf32>
    %49 = arith.addf %48, %11 : vector<32x256xf32>
    %50 = vector.extract_strided_slice %49 {offsets = [0, 0], sizes = [8, 128], strides = [1, 1]} : vector<32x256xf32> to vector<8x128xf32>
    %51 = arith.mulf %25, %50 : vector<8x128xf32>
    %cst_33 = arith.constant dense<0.000000e+00> : vector<8xf32>
    %52 = vector.multi_reduction <add>, %51, %cst_33 [1] : vector<8x128xf32> to vector<8xf32>
    %53 = vector.shape_cast %52 : vector<8xf32> to vector<8x1xf32>
    %cst_34 = arith.constant 0.176776692 : f32
    %54 = vector.broadcast %cst_34 : f32 to vector<8x1xf32>
    %55 = arith.mulf %53, %54 : vector<8x1xf32>
    %56 = vector.extract_strided_slice %49 {offsets = [8, 0], sizes = [8, 128], strides = [1, 1]} : vector<32x256xf32> to vector<8x128xf32>
    %57 = arith.mulf %25, %56 : vector<8x128xf32>
    %cst_35 = arith.constant dense<0.000000e+00> : vector<8xf32>
    %58 = vector.multi_reduction <add>, %57, %cst_35 [1] : vector<8x128xf32> to vector<8xf32>
    %59 = vector.shape_cast %58 : vector<8xf32> to vector<8x1xf32>
    %cst_36 = arith.constant 0.176776692 : f32
    %60 = vector.broadcast %cst_36 : f32 to vector<8x1xf32>
    %61 = arith.mulf %59, %60 : vector<8x1xf32>
    %62 = vector.extract_strided_slice %49 {offsets = [16, 0], sizes = [8, 128], strides = [1, 1]} : vector<32x256xf32> to vector<8x128xf32>
    %63 = arith.mulf %25, %62 : vector<8x128xf32>
    %cst_37 = arith.constant dense<0.000000e+00> : vector<8xf32>
    %64 = vector.multi_reduction <add>, %63, %cst_37 [1] : vector<8x128xf32> to vector<8xf32>
    %65 = vector.shape_cast %64 : vector<8xf32> to vector<8x1xf32>
    %cst_38 = arith.constant 0.176776692 : f32
    %66 = vector.broadcast %cst_38 : f32 to vector<8x1xf32>
    %67 = arith.mulf %65, %66 : vector<8x1xf32>
    %68 = vector.extract_strided_slice %49 {offsets = [24, 0], sizes = [8, 128], strides = [1, 1]} : vector<32x256xf32> to vector<8x128xf32>
    %69 = arith.mulf %25, %68 : vector<8x128xf32>
    %cst_39 = arith.constant dense<0.000000e+00> : vector<8xf32>
    %70 = vector.multi_reduction <add>, %69, %cst_39 [1] : vector<8x128xf32> to vector<8xf32>
    %71 = vector.shape_cast %70 : vector<8xf32> to vector<8x1xf32>
    %cst_40 = arith.constant 0.176776692 : f32
    %72 = vector.broadcast %cst_40 : f32 to vector<8x1xf32>
    %73 = arith.mulf %71, %72 : vector<8x1xf32>
    %74 = arith.maximumf %55, %61 : vector<8x1xf32>
    %75 = arith.maximumf %74, %67 : vector<8x1xf32>
    %76 = arith.maximumf %75, %73 : vector<8x1xf32>
    %77 = arith.subf %55, %76 : vector<8x1xf32>
    %78 = math.exp %77 : vector<8x1xf32>
    %79 = arith.subf %61, %76 : vector<8x1xf32>
    %80 = math.exp %79 : vector<8x1xf32>
    %81 = arith.subf %67, %76 : vector<8x1xf32>
    %82 = math.exp %81 : vector<8x1xf32>
    %83 = arith.subf %73, %76 : vector<8x1xf32>
    %84 = math.exp %83 : vector<8x1xf32>
    %85 = arith.addf %78, %80 : vector<8x1xf32>
    %86 = arith.addf %85, %82 : vector<8x1xf32>
    %87 = arith.addf %86, %84 : vector<8x1xf32>
    %88 = vector.extract_strided_slice %49 {offsets = [0, 128], sizes = [8, 128], strides = [1, 1]} : vector<32x256xf32> to vector<8x128xf32>
    %89 = vector.broadcast %78 : vector<8x1xf32> to vector<8x128xf32>
    %90 = arith.mulf %89, %88 : vector<8x128xf32>
    %91 = vector.extract_strided_slice %49 {offsets = [8, 128], sizes = [8, 128], strides = [1, 1]} : vector<32x256xf32> to vector<8x128xf32>
    %92 = vector.broadcast %80 : vector<8x1xf32> to vector<8x128xf32>
    %93 = arith.mulf %92, %91 : vector<8x128xf32>
    %94 = arith.addf %90, %93 : vector<8x128xf32>
    %95 = vector.extract_strided_slice %49 {offsets = [16, 128], sizes = [8, 128], strides = [1, 1]} : vector<32x256xf32> to vector<8x128xf32>
    %96 = vector.broadcast %82 : vector<8x1xf32> to vector<8x128xf32>
    %97 = arith.mulf %96, %95 : vector<8x128xf32>
    %98 = arith.addf %94, %97 : vector<8x128xf32>
    %99 = vector.extract_strided_slice %49 {offsets = [24, 128], sizes = [8, 128], strides = [1, 1]} : vector<32x256xf32> to vector<8x128xf32>
    %100 = vector.broadcast %84 : vector<8x1xf32> to vector<8x128xf32>
    %101 = arith.mulf %100, %99 : vector<8x128xf32>
    %102 = arith.addf %98, %101 : vector<8x128xf32>
    %103 = tpu.reciprocal %87 {approx = true} : vector<8x1xf32> -> vector<8x1xf32>
    %104 = vector.broadcast %103 : vector<8x1xf32> to vector<8x128xf32>
    %105 = arith.mulf %102, %104 : vector<8x128xf32>
    %106 = arith.addf %25, %105 : vector<8x128xf32>
    %107 = arith.negf %106 : vector<8x128xf32>
    %108 = math.exp %107 : vector<8x128xf32>
    %cst_41 = arith.constant 1.000000e+00 : f32
    %109 = vector.broadcast %cst_41 : f32 to vector<8x128xf32>
    %110 = arith.addf %109, %108 : vector<8x128xf32>
    %111 = arith.divf %109, %110 : vector<8x128xf32>
    %cst_42 = arith.constant dense<0.000000e+00> : vector<8x128xf32>
    %112 = tpu.matmul %111, %5, %cst_42 {dimension_numbers = #tpu.dot_dimension_numbers<[1], [0], [0], [1], [0, 0, 1, 1], [], []>} : vector<8x128xf32>, vector<128x128xf32>, vector<8x128xf32> -> vector<8x128xf32>
    %113 = arith.addf %112, %14 : vector<8x128xf32>
    %114 = arith.addf %113, %111 : vector<8x128xf32>
    %115 = arith.negf %114 : vector<8x128xf32>
    %116 = math.exp %115 : vector<8x128xf32>
    %cst_43 = arith.constant 1.000000e+00 : f32
    %117 = vector.broadcast %cst_43 : f32 to vector<8x128xf32>
    %118 = arith.addf %117, %116 : vector<8x128xf32>
    %119 = arith.divf %117, %118 : vector<8x128xf32>
    %120 = arith.index_cast %c0_i32_14 : i32 to index
    %c0_44 = arith.constant 0 : index
    %c0_45 = arith.constant 0 : index
    %121 = vector.load %arg9[%120, %c0_44, %c0_45] : memref<4x8x128xf32, #tpu.memory_space<vmem>>, vector<1x8x128xf32>
    %122 = vector.shape_cast %121 : vector<1x8x128xf32> to vector<8x128xf32>
    %123 = vector.shape_cast %119 : vector<8x128xf32> to vector<1x8x128xf32>
    tpu.vector_store %arg9[%120, %c0_44, %c0_45], %123 {strides = array<i32>} : memref<4x8x128xf32, #tpu.memory_space<vmem>>, vector<1x8x128xf32>,
    %c1_i32_46 = arith.constant 1 : i32
    %124 = arith.addi %20, %c1_i32_46 : i32
    %c15_i32_47 = arith.constant 15 : i32
    %125 = arith.andi %124, %c15_i32_47 : i32
    %126 = arith.index_cast %125 : i32 to index
    %c0_48 = arith.constant 0 : index
    %c0_49 = arith.constant 0 : index
    %127 = vector.load %arg10[%126, %c0_48, %c0_49] : memref<16x8x128xf32, #tpu.memory_space<vmem>>, vector<1x8x128xf32>
    %128 = vector.shape_cast %127 : vector<1x8x128xf32> to vector<8x128xf32>
    %129 = vector.shape_cast %111 : vector<8x128xf32> to vector<1x8x128xf32>
    tpu.vector_store %arg10[%126, %c0_48, %c0_49], %129 {strides = array<i32>} : memref<16x8x128xf32, #tpu.memory_space<vmem>>, vector<1x8x128xf32>,
    %c1_i32_50 = arith.constant 1 : i32
    %130 = arith.addi %15, %c1_i32_50 : i32
    %131 = arith.index_cast %c1_i32_50 : i32 to index
    %c0_51 = arith.constant 0 : index
    %c0_52 = arith.constant 0 : index
    %132 = vector.load %arg2[%131, %c0_51, %c0_52] : memref<4x8x128xf32, #tpu.memory_space<vmem>>, vector<1x8x128xf32>
    %133 = vector.shape_cast %132 : vector<1x8x128xf32> to vector<8x128xf32>
    %cst_53 = arith.constant dense<0.000000e+00> : vector<8x128xf32>
    %134 = tpu.matmul %133, %3, %cst_53 {dimension_numbers = #tpu.dot_dimension_numbers<[1], [0], [0], [1], [0, 0, 1, 1], [], []>} : vector<8x128xf32>, vector<128x128xf32>, vector<8x128xf32> -> vector<8x128xf32>
    %135 = arith.addf %134, %8 : vector<8x128xf32>
    %c1_i32_54 = arith.constant 1 : i32
    %136 = arith.addi %130, %c1_i32_54 : i32
    %c2_i32_55 = arith.constant 2 : i32
    %137 = arith.subi %136, %c2_i32_55 : i32
    %c0_i32_56 = arith.constant 0 : i32
    %138 = arith.maxsi %137, %c0_i32_56 : i32
    %c15_i32_57 = arith.constant 15 : i32
    %139 = arith.andi %138, %c15_i32_57 : i32
    %140 = arith.index_cast %139 : i32 to index
    %c0_58 = arith.constant 0 : index
    %c0_59 = arith.constant 0 : index
    %141 = vector.load %arg10[%140, %c0_58, %c0_59] : memref<16x8x128xf32, #tpu.memory_space<vmem>>, vector<1x8x128xf32>
    %142 = vector.shape_cast %141 : vector<1x8x128xf32> to vector<8x128xf32>
    %c1_i32_60 = arith.constant 1 : i32
    %143 = arith.addi %130, %c1_i32_60 : i32
    %c4_i32_61 = arith.constant 4 : i32
    %144 = arith.subi %143, %c4_i32_61 : i32
    %c0_i32_62 = arith.constant 0 : i32
    %145 = arith.maxsi %144, %c0_i32_62 : i32
    %c15_i32_63 = arith.constant 15 : i32
    %146 = arith.andi %145, %c15_i32_63 : i32
    %147 = arith.index_cast %146 : i32 to index
    %c0_64 = arith.constant 0 : index
    %c0_65 = arith.constant 0 : index
    %148 = vector.load %arg10[%147, %c0_64, %c0_65] : memref<16x8x128xf32, #tpu.memory_space<vmem>>, vector<1x8x128xf32>
    %149 = vector.shape_cast %148 : vector<1x8x128xf32> to vector<8x128xf32>
    %c1_i32_66 = arith.constant 1 : i32
    %150 = arith.addi %130, %c1_i32_66 : i32
    %c8_i32_67 = arith.constant 8 : i32
    %151 = arith.subi %150, %c8_i32_67 : i32
    %c0_i32_68 = arith.constant 0 : i32
    %152 = arith.maxsi %151, %c0_i32_68 : i32
    %c15_i32_69 = arith.constant 15 : i32
    %153 = arith.andi %152, %c15_i32_69 : i32
    %154 = arith.index_cast %153 : i32 to index
    %c0_70 = arith.constant 0 : index
    %c0_71 = arith.constant 0 : index
    %155 = vector.load %arg10[%154, %c0_70, %c0_71] : memref<16x8x128xf32, #tpu.memory_space<vmem>>, vector<1x8x128xf32>
    %156 = vector.shape_cast %155 : vector<1x8x128xf32> to vector<8x128xf32>
    %157 = tpu.concatenate %111, %142, %149, %156 in 0 : vector<8x128xf32>, vector<8x128xf32>, vector<8x128xf32>, vector<8x128xf32> -> vector<32x128xf32>
    %cst_72 = arith.constant dense<0.000000e+00> : vector<32x256xf32>
    %158 = tpu.matmul %157, %4, %cst_72 {dimension_numbers = #tpu.dot_dimension_numbers<[1], [0], [0], [1], [0, 0, 1, 1], [], []>} : vector<32x128xf32>, vector<128x256xf32>, vector<32x256xf32> -> vector<32x256xf32>
    %159 = arith.addf %158, %11 : vector<32x256xf32>
    %160 = vector.extract_strided_slice %159 {offsets = [0, 0], sizes = [8, 128], strides = [1, 1]} : vector<32x256xf32> to vector<8x128xf32>
    %161 = arith.mulf %135, %160 : vector<8x128xf32>
    %cst_73 = arith.constant dense<0.000000e+00> : vector<8xf32>
    %162 = vector.multi_reduction <add>, %161, %cst_73 [1] : vector<8x128xf32> to vector<8xf32>
    %163 = vector.shape_cast %162 : vector<8xf32> to vector<8x1xf32>
    %cst_74 = arith.constant 0.176776692 : f32
    %164 = vector.broadcast %cst_74 : f32 to vector<8x1xf32>
    %165 = arith.mulf %163, %164 : vector<8x1xf32>
    %166 = vector.extract_strided_slice %159 {offsets = [8, 0], sizes = [8, 128], strides = [1, 1]} : vector<32x256xf32> to vector<8x128xf32>
    %167 = arith.mulf %135, %166 : vector<8x128xf32>
    %cst_75 = arith.constant dense<0.000000e+00> : vector<8xf32>
    %168 = vector.multi_reduction <add>, %167, %cst_75 [1] : vector<8x128xf32> to vector<8xf32>
    %169 = vector.shape_cast %168 : vector<8xf32> to vector<8x1xf32>
    %cst_76 = arith.constant 0.176776692 : f32
    %170 = vector.broadcast %cst_76 : f32 to vector<8x1xf32>
    %171 = arith.mulf %169, %170 : vector<8x1xf32>
    %172 = vector.extract_strided_slice %159 {offsets = [16, 0], sizes = [8, 128], strides = [1, 1]} : vector<32x256xf32> to vector<8x128xf32>
    %173 = arith.mulf %135, %172 : vector<8x128xf32>
    %cst_77 = arith.constant dense<0.000000e+00> : vector<8xf32>
    %174 = vector.multi_reduction <add>, %173, %cst_77 [1] : vector<8x128xf32> to vector<8xf32>
    %175 = vector.shape_cast %174 : vector<8xf32> to vector<8x1xf32>
    %cst_78 = arith.constant 0.176776692 : f32
    %176 = vector.broadcast %cst_78 : f32 to vector<8x1xf32>
    %177 = arith.mulf %175, %176 : vector<8x1xf32>
    %178 = vector.extract_strided_slice %159 {offsets = [24, 0], sizes = [8, 128], strides = [1, 1]} : vector<32x256xf32> to vector<8x128xf32>
    %179 = arith.mulf %135, %178 : vector<8x128xf32>
    %cst_79 = arith.constant dense<0.000000e+00> : vector<8xf32>
    %180 = vector.multi_reduction <add>, %179, %cst_79 [1] : vector<8x128xf32> to vector<8xf32>
    %181 = vector.shape_cast %180 : vector<8xf32> to vector<8x1xf32>
    %cst_80 = arith.constant 0.176776692 : f32
    %182 = vector.broadcast %cst_80 : f32 to vector<8x1xf32>
    %183 = arith.mulf %181, %182 : vector<8x1xf32>
    %184 = arith.maximumf %165, %171 : vector<8x1xf32>
    %185 = arith.maximumf %184, %177 : vector<8x1xf32>
    %186 = arith.maximumf %185, %183 : vector<8x1xf32>
    %187 = arith.subf %165, %186 : vector<8x1xf32>
    %188 = math.exp %187 : vector<8x1xf32>
    %189 = arith.subf %171, %186 : vector<8x1xf32>
    %190 = math.exp %189 : vector<8x1xf32>
    %191 = arith.subf %177, %186 : vector<8x1xf32>
    %192 = math.exp %191 : vector<8x1xf32>
    %193 = arith.subf %183, %186 : vector<8x1xf32>
    %194 = math.exp %193 : vector<8x1xf32>
    %195 = arith.addf %188, %190 : vector<8x1xf32>
    %196 = arith.addf %195, %192 : vector<8x1xf32>
    %197 = arith.addf %196, %194 : vector<8x1xf32>
    %198 = vector.extract_strided_slice %159 {offsets = [0, 128], sizes = [8, 128], strides = [1, 1]} : vector<32x256xf32> to vector<8x128xf32>
    %199 = vector.broadcast %188 : vector<8x1xf32> to vector<8x128xf32>
    %200 = arith.mulf %199, %198 : vector<8x128xf32>
    %201 = vector.extract_strided_slice %159 {offsets = [8, 128], sizes = [8, 128], strides = [1, 1]} : vector<32x256xf32> to vector<8x128xf32>
    %202 = vector.broadcast %190 : vector<8x1xf32> to vector<8x128xf32>
    %203 = arith.mulf %202, %201 : vector<8x128xf32>
    %204 = arith.addf %200, %203 : vector<8x128xf32>
    %205 = vector.extract_strided_slice %159 {offsets = [16, 128], sizes = [8, 128], strides = [1, 1]} : vector<32x256xf32> to vector<8x128xf32>
    %206 = vector.broadcast %192 : vector<8x1xf32> to vector<8x128xf32>
    %207 = arith.mulf %206, %205 : vector<8x128xf32>
    %208 = arith.addf %204, %207 : vector<8x128xf32>
    %209 = vector.extract_strided_slice %159 {offsets = [24, 128], sizes = [8, 128], strides = [1, 1]} : vector<32x256xf32> to vector<8x128xf32>
    %210 = vector.broadcast %194 : vector<8x1xf32> to vector<8x128xf32>
    %211 = arith.mulf %210, %209 : vector<8x128xf32>
    %212 = arith.addf %208, %211 : vector<8x128xf32>
    %213 = tpu.reciprocal %197 {approx = true} : vector<8x1xf32> -> vector<8x1xf32>
    %214 = vector.broadcast %213 : vector<8x1xf32> to vector<8x128xf32>
    %215 = arith.mulf %212, %214 : vector<8x128xf32>
    %216 = arith.addf %135, %215 : vector<8x128xf32>
    %217 = arith.negf %216 : vector<8x128xf32>
    %218 = math.exp %217 : vector<8x128xf32>
    %cst_81 = arith.constant 1.000000e+00 : f32
    %219 = vector.broadcast %cst_81 : f32 to vector<8x128xf32>
    %220 = arith.addf %219, %218 : vector<8x128xf32>
    %221 = arith.divf %219, %220 : vector<8x128xf32>
    %cst_82 = arith.constant dense<0.000000e+00> : vector<8x128xf32>
    %222 = tpu.matmul %221, %5, %cst_82 {dimension_numbers = #tpu.dot_dimension_numbers<[1], [0], [0], [1], [0, 0, 1, 1], [], []>} : vector<8x128xf32>, vector<128x128xf32>, vector<8x128xf32> -> vector<8x128xf32>
    %223 = arith.addf %222, %14 : vector<8x128xf32>
    %224 = arith.addf %223, %221 : vector<8x128xf32>
    %225 = arith.negf %224 : vector<8x128xf32>
    %226 = math.exp %225 : vector<8x128xf32>
    %cst_83 = arith.constant 1.000000e+00 : f32
    %227 = vector.broadcast %cst_83 : f32 to vector<8x128xf32>
    %228 = arith.addf %227, %226 : vector<8x128xf32>
    %229 = arith.divf %227, %228 : vector<8x128xf32>
    %230 = arith.index_cast %c1_i32_50 : i32 to index
    %c0_84 = arith.constant 0 : index
    %c0_85 = arith.constant 0 : index
    %231 = vector.load %arg9[%230, %c0_84, %c0_85] : memref<4x8x128xf32, #tpu.memory_space<vmem>>, vector<1x8x128xf32>
    %232 = vector.shape_cast %231 : vector<1x8x128xf32> to vector<8x128xf32>
    %233 = vector.shape_cast %229 : vector<8x128xf32> to vector<1x8x128xf32>
    tpu.vector_store %arg9[%230, %c0_84, %c0_85], %233 {strides = array<i32>} : memref<4x8x128xf32, #tpu.memory_space<vmem>>, vector<1x8x128xf32>,
    %c1_i32_86 = arith.constant 1 : i32
    %234 = arith.addi %130, %c1_i32_86 : i32
    %c15_i32_87 = arith.constant 15 : i32
    %235 = arith.andi %234, %c15_i32_87 : i32
    %236 = arith.index_cast %235 : i32 to index
    %c0_88 = arith.constant 0 : index
    %c0_89 = arith.constant 0 : index
    %237 = vector.load %arg10[%236, %c0_88, %c0_89] : memref<16x8x128xf32, #tpu.memory_space<vmem>>, vector<1x8x128xf32>
    %238 = vector.shape_cast %237 : vector<1x8x128xf32> to vector<8x128xf32>
    %239 = vector.shape_cast %221 : vector<8x128xf32> to vector<1x8x128xf32>
    tpu.vector_store %arg10[%236, %c0_88, %c0_89], %239 {strides = array<i32>} : memref<16x8x128xf32, #tpu.memory_space<vmem>>, vector<1x8x128xf32>,
    %c2_i32_90 = arith.constant 2 : i32
    %240 = arith.addi %15, %c2_i32_90 : i32
    %241 = arith.index_cast %c2_i32_90 : i32 to index
    %c0_91 = arith.constant 0 : index
    %c0_92 = arith.constant 0 : index
    %242 = vector.load %arg2[%241, %c0_91, %c0_92] : memref<4x8x128xf32, #tpu.memory_space<vmem>>, vector<1x8x128xf32>
    %243 = vector.shape_cast %242 : vector<1x8x128xf32> to vector<8x128xf32>
    %cst_93 = arith.constant dense<0.000000e+00> : vector<8x128xf32>
    %244 = tpu.matmul %243, %3, %cst_93 {dimension_numbers = #tpu.dot_dimension_numbers<[1], [0], [0], [1], [0, 0, 1, 1], [], []>} : vector<8x128xf32>, vector<128x128xf32>, vector<8x128xf32> -> vector<8x128xf32>
    %245 = arith.addf %244, %8 : vector<8x128xf32>
    %c1_i32_94 = arith.constant 1 : i32
    %246 = arith.addi %240, %c1_i32_94 : i32
    %c2_i32_95 = arith.constant 2 : i32
    %247 = arith.subi %246, %c2_i32_95 : i32
    %c0_i32_96 = arith.constant 0 : i32
    %248 = arith.maxsi %247, %c0_i32_96 : i32
    %c15_i32_97 = arith.constant 15 : i32
    %249 = arith.andi %248, %c15_i32_97 : i32
    %250 = arith.index_cast %249 : i32 to index
    %c0_98 = arith.constant 0 : index
    %c0_99 = arith.constant 0 : index
    %251 = vector.load %arg10[%250, %c0_98, %c0_99] : memref<16x8x128xf32, #tpu.memory_space<vmem>>, vector<1x8x128xf32>
    %252 = vector.shape_cast %251 : vector<1x8x128xf32> to vector<8x128xf32>
    %c1_i32_100 = arith.constant 1 : i32
    %253 = arith.addi %240, %c1_i32_100 : i32
    %c4_i32_101 = arith.constant 4 : i32
    %254 = arith.subi %253, %c4_i32_101 : i32
    %c0_i32_102 = arith.constant 0 : i32
    %255 = arith.maxsi %254, %c0_i32_102 : i32
    %c15_i32_103 = arith.constant 15 : i32
    %256 = arith.andi %255, %c15_i32_103 : i32
    %257 = arith.index_cast %256 : i32 to index
    %c0_104 = arith.constant 0 : index
    %c0_105 = arith.constant 0 : index
    %258 = vector.load %arg10[%257, %c0_104, %c0_105] : memref<16x8x128xf32, #tpu.memory_space<vmem>>, vector<1x8x128xf32>
    %259 = vector.shape_cast %258 : vector<1x8x128xf32> to vector<8x128xf32>
    %c1_i32_106 = arith.constant 1 : i32
    %260 = arith.addi %240, %c1_i32_106 : i32
    %c8_i32_107 = arith.constant 8 : i32
    %261 = arith.subi %260, %c8_i32_107 : i32
    %c0_i32_108 = arith.constant 0 : i32
    %262 = arith.maxsi %261, %c0_i32_108 : i32
    %c15_i32_109 = arith.constant 15 : i32
    %263 = arith.andi %262, %c15_i32_109 : i32
    %264 = arith.index_cast %263 : i32 to index
    %c0_110 = arith.constant 0 : index
    %c0_111 = arith.constant 0 : index
    %265 = vector.load %arg10[%264, %c0_110, %c0_111] : memref<16x8x128xf32, #tpu.memory_space<vmem>>, vector<1x8x128xf32>
    %266 = vector.shape_cast %265 : vector<1x8x128xf32> to vector<8x128xf32>
    %267 = tpu.concatenate %221, %252, %259, %266 in 0 : vector<8x128xf32>, vector<8x128xf32>, vector<8x128xf32>, vector<8x128xf32> -> vector<32x128xf32>
    %cst_112 = arith.constant dense<0.000000e+00> : vector<32x256xf32>
    %268 = tpu.matmul %267, %4, %cst_112 {dimension_numbers = #tpu.dot_dimension_numbers<[1], [0], [0], [1], [0, 0, 1, 1], [], []>} : vector<32x128xf32>, vector<128x256xf32>, vector<32x256xf32> -> vector<32x256xf32>
    %269 = arith.addf %268, %11 : vector<32x256xf32>
    %270 = vector.extract_strided_slice %269 {offsets = [0, 0], sizes = [8, 128], strides = [1, 1]} : vector<32x256xf32> to vector<8x128xf32>
    %271 = arith.mulf %245, %270 : vector<8x128xf32>
    %cst_113 = arith.constant dense<0.000000e+00> : vector<8xf32>
    %272 = vector.multi_reduction <add>, %271, %cst_113 [1] : vector<8x128xf32> to vector<8xf32>
    %273 = vector.shape_cast %272 : vector<8xf32> to vector<8x1xf32>
    %cst_114 = arith.constant 0.176776692 : f32
    %274 = vector.broadcast %cst_114 : f32 to vector<8x1xf32>
    %275 = arith.mulf %273, %274 : vector<8x1xf32>
    %276 = vector.extract_strided_slice %269 {offsets = [8, 0], sizes = [8, 128], strides = [1, 1]} : vector<32x256xf32> to vector<8x128xf32>
    %277 = arith.mulf %245, %276 : vector<8x128xf32>
    %cst_115 = arith.constant dense<0.000000e+00> : vector<8xf32>
    %278 = vector.multi_reduction <add>, %277, %cst_115 [1] : vector<8x128xf32> to vector<8xf32>
    %279 = vector.shape_cast %278 : vector<8xf32> to vector<8x1xf32>
    %cst_116 = arith.constant 0.176776692 : f32
    %280 = vector.broadcast %cst_116 : f32 to vector<8x1xf32>
    %281 = arith.mulf %279, %280 : vector<8x1xf32>
    %282 = vector.extract_strided_slice %269 {offsets = [16, 0], sizes = [8, 128], strides = [1, 1]} : vector<32x256xf32> to vector<8x128xf32>
    %283 = arith.mulf %245, %282 : vector<8x128xf32>
    %cst_117 = arith.constant dense<0.000000e+00> : vector<8xf32>
    %284 = vector.multi_reduction <add>, %283, %cst_117 [1] : vector<8x128xf32> to vector<8xf32>
    %285 = vector.shape_cast %284 : vector<8xf32> to vector<8x1xf32>
    %cst_118 = arith.constant 0.176776692 : f32
    %286 = vector.broadcast %cst_118 : f32 to vector<8x1xf32>
    %287 = arith.mulf %285, %286 : vector<8x1xf32>
    %288 = vector.extract_strided_slice %269 {offsets = [24, 0], sizes = [8, 128], strides = [1, 1]} : vector<32x256xf32> to vector<8x128xf32>
    %289 = arith.mulf %245, %288 : vector<8x128xf32>
    %cst_119 = arith.constant dense<0.000000e+00> : vector<8xf32>
    %290 = vector.multi_reduction <add>, %289, %cst_119 [1] : vector<8x128xf32> to vector<8xf32>
    %291 = vector.shape_cast %290 : vector<8xf32> to vector<8x1xf32>
    %cst_120 = arith.constant 0.176776692 : f32
    %292 = vector.broadcast %cst_120 : f32 to vector<8x1xf32>
    %293 = arith.mulf %291, %292 : vector<8x1xf32>
    %294 = arith.maximumf %275, %281 : vector<8x1xf32>
    %295 = arith.maximumf %294, %287 : vector<8x1xf32>
    %296 = arith.maximumf %295, %293 : vector<8x1xf32>
    %297 = arith.subf %275, %296 : vector<8x1xf32>
    %298 = math.exp %297 : vector<8x1xf32>
    %299 = arith.subf %281, %296 : vector<8x1xf32>
    %300 = math.exp %299 : vector<8x1xf32>
    %301 = arith.subf %287, %296 : vector<8x1xf32>
    %302 = math.exp %301 : vector<8x1xf32>
    %303 = arith.subf %293, %296 : vector<8x1xf32>
    %304 = math.exp %303 : vector<8x1xf32>
    %305 = arith.addf %298, %300 : vector<8x1xf32>
    %306 = arith.addf %305, %302 : vector<8x1xf32>
    %307 = arith.addf %306, %304 : vector<8x1xf32>
    %308 = vector.extract_strided_slice %269 {offsets = [0, 128], sizes = [8, 128], strides = [1, 1]} : vector<32x256xf32> to vector<8x128xf32>
    %309 = vector.broadcast %298 : vector<8x1xf32> to vector<8x128xf32>
    %310 = arith.mulf %309, %308 : vector<8x128xf32>
    %311 = vector.extract_strided_slice %269 {offsets = [8, 128], sizes = [8, 128], strides = [1, 1]} : vector<32x256xf32> to vector<8x128xf32>
    %312 = vector.broadcast %300 : vector<8x1xf32> to vector<8x128xf32>
    %313 = arith.mulf %312, %311 : vector<8x128xf32>
    %314 = arith.addf %310, %313 : vector<8x128xf32>
    %315 = vector.extract_strided_slice %269 {offsets = [16, 128], sizes = [8, 128], strides = [1, 1]} : vector<32x256xf32> to vector<8x128xf32>
    %316 = vector.broadcast %302 : vector<8x1xf32> to vector<8x128xf32>
    %317 = arith.mulf %316, %315 : vector<8x128xf32>
    %318 = arith.addf %314, %317 : vector<8x128xf32>
    %319 = vector.extract_strided_slice %269 {offsets = [24, 128], sizes = [8, 128], strides = [1, 1]} : vector<32x256xf32> to vector<8x128xf32>
    %320 = vector.broadcast %304 : vector<8x1xf32> to vector<8x128xf32>
    %321 = arith.mulf %320, %319 : vector<8x128xf32>
    %322 = arith.addf %318, %321 : vector<8x128xf32>
    %323 = tpu.reciprocal %307 {approx = true} : vector<8x1xf32> -> vector<8x1xf32>
    %324 = vector.broadcast %323 : vector<8x1xf32> to vector<8x128xf32>
    %325 = arith.mulf %322, %324 : vector<8x128xf32>
    %326 = arith.addf %245, %325 : vector<8x128xf32>
    %327 = arith.negf %326 : vector<8x128xf32>
    %328 = math.exp %327 : vector<8x128xf32>
    %cst_121 = arith.constant 1.000000e+00 : f32
    %329 = vector.broadcast %cst_121 : f32 to vector<8x128xf32>
    %330 = arith.addf %329, %328 : vector<8x128xf32>
    %331 = arith.divf %329, %330 : vector<8x128xf32>
    %cst_122 = arith.constant dense<0.000000e+00> : vector<8x128xf32>
    %332 = tpu.matmul %331, %5, %cst_122 {dimension_numbers = #tpu.dot_dimension_numbers<[1], [0], [0], [1], [0, 0, 1, 1], [], []>} : vector<8x128xf32>, vector<128x128xf32>, vector<8x128xf32> -> vector<8x128xf32>
    %333 = arith.addf %332, %14 : vector<8x128xf32>
    %334 = arith.addf %333, %331 : vector<8x128xf32>
    %335 = arith.negf %334 : vector<8x128xf32>
    %336 = math.exp %335 : vector<8x128xf32>
    %cst_123 = arith.constant 1.000000e+00 : f32
    %337 = vector.broadcast %cst_123 : f32 to vector<8x128xf32>
    %338 = arith.addf %337, %336 : vector<8x128xf32>
    %339 = arith.divf %337, %338 : vector<8x128xf32>
    %340 = arith.index_cast %c2_i32_90 : i32 to index
    %c0_124 = arith.constant 0 : index
    %c0_125 = arith.constant 0 : index
    %341 = vector.load %arg9[%340, %c0_124, %c0_125] : memref<4x8x128xf32, #tpu.memory_space<vmem>>, vector<1x8x128xf32>
    %342 = vector.shape_cast %341 : vector<1x8x128xf32> to vector<8x128xf32>
    %343 = vector.shape_cast %339 : vector<8x128xf32> to vector<1x8x128xf32>
    tpu.vector_store %arg9[%340, %c0_124, %c0_125], %343 {strides = array<i32>} : memref<4x8x128xf32, #tpu.memory_space<vmem>>, vector<1x8x128xf32>,
    %c1_i32_126 = arith.constant 1 : i32
    %344 = arith.addi %240, %c1_i32_126 : i32
    %c15_i32_127 = arith.constant 15 : i32
    %345 = arith.andi %344, %c15_i32_127 : i32
    %346 = arith.index_cast %345 : i32 to index
    %c0_128 = arith.constant 0 : index
    %c0_129 = arith.constant 0 : index
    %347 = vector.load %arg10[%346, %c0_128, %c0_129] : memref<16x8x128xf32, #tpu.memory_space<vmem>>, vector<1x8x128xf32>
    %348 = vector.shape_cast %347 : vector<1x8x128xf32> to vector<8x128xf32>
    %349 = vector.shape_cast %331 : vector<8x128xf32> to vector<1x8x128xf32>
    tpu.vector_store %arg10[%346, %c0_128, %c0_129], %349 {strides = array<i32>} : memref<16x8x128xf32, #tpu.memory_space<vmem>>, vector<1x8x128xf32>,
    %c3_i32 = arith.constant 3 : i32
    %350 = arith.addi %15, %c3_i32 : i32
    %351 = arith.index_cast %c3_i32 : i32 to index
    %c0_130 = arith.constant 0 : index
    %c0_131 = arith.constant 0 : index
    %352 = vector.load %arg2[%351, %c0_130, %c0_131] : memref<4x8x128xf32, #tpu.memory_space<vmem>>, vector<1x8x128xf32>
    %353 = vector.shape_cast %352 : vector<1x8x128xf32> to vector<8x128xf32>
    %cst_132 = arith.constant dense<0.000000e+00> : vector<8x128xf32>
    %354 = tpu.matmul %353, %3, %cst_132 {dimension_numbers = #tpu.dot_dimension_numbers<[1], [0], [0], [1], [0, 0, 1, 1], [], []>} : vector<8x128xf32>, vector<128x128xf32>, vector<8x128xf32> -> vector<8x128xf32>
    %355 = arith.addf %354, %8 : vector<8x128xf32>
    %c1_i32_133 = arith.constant 1 : i32
    %356 = arith.addi %350, %c1_i32_133 : i32
    %c2_i32_134 = arith.constant 2 : i32
    %357 = arith.subi %356, %c2_i32_134 : i32
    %c0_i32_135 = arith.constant 0 : i32
    %358 = arith.maxsi %357, %c0_i32_135 : i32
    %c15_i32_136 = arith.constant 15 : i32
    %359 = arith.andi %358, %c15_i32_136 : i32
    %360 = arith.index_cast %359 : i32 to index
    %c0_137 = arith.constant 0 : index
    %c0_138 = arith.constant 0 : index
    %361 = vector.load %arg10[%360, %c0_137, %c0_138] : memref<16x8x128xf32, #tpu.memory_space<vmem>>, vector<1x8x128xf32>
    %362 = vector.shape_cast %361 : vector<1x8x128xf32> to vector<8x128xf32>
    %c1_i32_139 = arith.constant 1 : i32
    %363 = arith.addi %350, %c1_i32_139 : i32
    %c4_i32_140 = arith.constant 4 : i32
    %364 = arith.subi %363, %c4_i32_140 : i32
    %c0_i32_141 = arith.constant 0 : i32
    %365 = arith.maxsi %364, %c0_i32_141 : i32
    %c15_i32_142 = arith.constant 15 : i32
    %366 = arith.andi %365, %c15_i32_142 : i32
    %367 = arith.index_cast %366 : i32 to index
    %c0_143 = arith.constant 0 : index
    %c0_144 = arith.constant 0 : index
    %368 = vector.load %arg10[%367, %c0_143, %c0_144] : memref<16x8x128xf32, #tpu.memory_space<vmem>>, vector<1x8x128xf32>
    %369 = vector.shape_cast %368 : vector<1x8x128xf32> to vector<8x128xf32>
    %c1_i32_145 = arith.constant 1 : i32
    %370 = arith.addi %350, %c1_i32_145 : i32
    %c8_i32_146 = arith.constant 8 : i32
    %371 = arith.subi %370, %c8_i32_146 : i32
    %c0_i32_147 = arith.constant 0 : i32
    %372 = arith.maxsi %371, %c0_i32_147 : i32
    %c15_i32_148 = arith.constant 15 : i32
    %373 = arith.andi %372, %c15_i32_148 : i32
    %374 = arith.index_cast %373 : i32 to index
    %c0_149 = arith.constant 0 : index
    %c0_150 = arith.constant 0 : index
    %375 = vector.load %arg10[%374, %c0_149, %c0_150] : memref<16x8x128xf32, #tpu.memory_space<vmem>>, vector<1x8x128xf32>
    %376 = vector.shape_cast %375 : vector<1x8x128xf32> to vector<8x128xf32>
    %377 = tpu.concatenate %331, %362, %369, %376 in 0 : vector<8x128xf32>, vector<8x128xf32>, vector<8x128xf32>, vector<8x128xf32> -> vector<32x128xf32>
    %cst_151 = arith.constant dense<0.000000e+00> : vector<32x256xf32>
    %378 = tpu.matmul %377, %4, %cst_151 {dimension_numbers = #tpu.dot_dimension_numbers<[1], [0], [0], [1], [0, 0, 1, 1], [], []>} : vector<32x128xf32>, vector<128x256xf32>, vector<32x256xf32> -> vector<32x256xf32>
    %379 = arith.addf %378, %11 : vector<32x256xf32>
    %380 = vector.extract_strided_slice %379 {offsets = [0, 0], sizes = [8, 128], strides = [1, 1]} : vector<32x256xf32> to vector<8x128xf32>
    %381 = arith.mulf %355, %380 : vector<8x128xf32>
    %cst_152 = arith.constant dense<0.000000e+00> : vector<8xf32>
    %382 = vector.multi_reduction <add>, %381, %cst_152 [1] : vector<8x128xf32> to vector<8xf32>
    %383 = vector.shape_cast %382 : vector<8xf32> to vector<8x1xf32>
    %cst_153 = arith.constant 0.176776692 : f32
    %384 = vector.broadcast %cst_153 : f32 to vector<8x1xf32>
    %385 = arith.mulf %383, %384 : vector<8x1xf32>
    %386 = vector.extract_strided_slice %379 {offsets = [8, 0], sizes = [8, 128], strides = [1, 1]} : vector<32x256xf32> to vector<8x128xf32>
    %387 = arith.mulf %355, %386 : vector<8x128xf32>
    %cst_154 = arith.constant dense<0.000000e+00> : vector<8xf32>
    %388 = vector.multi_reduction <add>, %387, %cst_154 [1] : vector<8x128xf32> to vector<8xf32>
    %389 = vector.shape_cast %388 : vector<8xf32> to vector<8x1xf32>
    %cst_155 = arith.constant 0.176776692 : f32
    %390 = vector.broadcast %cst_155 : f32 to vector<8x1xf32>
    %391 = arith.mulf %389, %390 : vector<8x1xf32>
    %392 = vector.extract_strided_slice %379 {offsets = [16, 0], sizes = [8, 128], strides = [1, 1]} : vector<32x256xf32> to vector<8x128xf32>
    %393 = arith.mulf %355, %392 : vector<8x128xf32>
    %cst_156 = arith.constant dense<0.000000e+00> : vector<8xf32>
    %394 = vector.multi_reduction <add>, %393, %cst_156 [1] : vector<8x128xf32> to vector<8xf32>
    %395 = vector.shape_cast %394 : vector<8xf32> to vector<8x1xf32>
    %cst_157 = arith.constant 0.176776692 : f32
    %396 = vector.broadcast %cst_157 : f32 to vector<8x1xf32>
    %397 = arith.mulf %395, %396 : vector<8x1xf32>
    %398 = vector.extract_strided_slice %379 {offsets = [24, 0], sizes = [8, 128], strides = [1, 1]} : vector<32x256xf32> to vector<8x128xf32>
    %399 = arith.mulf %355, %398 : vector<8x128xf32>
    %cst_158 = arith.constant dense<0.000000e+00> : vector<8xf32>
    %400 = vector.multi_reduction <add>, %399, %cst_158 [1] : vector<8x128xf32> to vector<8xf32>
    %401 = vector.shape_cast %400 : vector<8xf32> to vector<8x1xf32>
    %cst_159 = arith.constant 0.176776692 : f32
    %402 = vector.broadcast %cst_159 : f32 to vector<8x1xf32>
    %403 = arith.mulf %401, %402 : vector<8x1xf32>
    %404 = arith.maximumf %385, %391 : vector<8x1xf32>
    %405 = arith.maximumf %404, %397 : vector<8x1xf32>
    %406 = arith.maximumf %405, %403 : vector<8x1xf32>
    %407 = arith.subf %385, %406 : vector<8x1xf32>
    %408 = math.exp %407 : vector<8x1xf32>
    %409 = arith.subf %391, %406 : vector<8x1xf32>
    %410 = math.exp %409 : vector<8x1xf32>
    %411 = arith.subf %397, %406 : vector<8x1xf32>
    %412 = math.exp %411 : vector<8x1xf32>
    %413 = arith.subf %403, %406 : vector<8x1xf32>
    %414 = math.exp %413 : vector<8x1xf32>
    %415 = arith.addf %408, %410 : vector<8x1xf32>
    %416 = arith.addf %415, %412 : vector<8x1xf32>
    %417 = arith.addf %416, %414 : vector<8x1xf32>
    %418 = vector.extract_strided_slice %379 {offsets = [0, 128], sizes = [8, 128], strides = [1, 1]} : vector<32x256xf32> to vector<8x128xf32>
    %419 = vector.broadcast %408 : vector<8x1xf32> to vector<8x128xf32>
    %420 = arith.mulf %419, %418 : vector<8x128xf32>
    %421 = vector.extract_strided_slice %379 {offsets = [8, 128], sizes = [8, 128], strides = [1, 1]} : vector<32x256xf32> to vector<8x128xf32>
    %422 = vector.broadcast %410 : vector<8x1xf32> to vector<8x128xf32>
    %423 = arith.mulf %422, %421 : vector<8x128xf32>
    %424 = arith.addf %420, %423 : vector<8x128xf32>
    %425 = vector.extract_strided_slice %379 {offsets = [16, 128], sizes = [8, 128], strides = [1, 1]} : vector<32x256xf32> to vector<8x128xf32>
    %426 = vector.broadcast %412 : vector<8x1xf32> to vector<8x128xf32>
    %427 = arith.mulf %426, %425 : vector<8x128xf32>
    %428 = arith.addf %424, %427 : vector<8x128xf32>
    %429 = vector.extract_strided_slice %379 {offsets = [24, 128], sizes = [8, 128], strides = [1, 1]} : vector<32x256xf32> to vector<8x128xf32>
    %430 = vector.broadcast %414 : vector<8x1xf32> to vector<8x128xf32>
    %431 = arith.mulf %430, %429 : vector<8x128xf32>
    %432 = arith.addf %428, %431 : vector<8x128xf32>
    %433 = tpu.reciprocal %417 {approx = true} : vector<8x1xf32> -> vector<8x1xf32>
    %434 = vector.broadcast %433 : vector<8x1xf32> to vector<8x128xf32>
    %435 = arith.mulf %432, %434 : vector<8x128xf32>
    %436 = arith.addf %355, %435 : vector<8x128xf32>
    %437 = arith.negf %436 : vector<8x128xf32>
    %438 = math.exp %437 : vector<8x128xf32>
    %cst_160 = arith.constant 1.000000e+00 : f32
    %439 = vector.broadcast %cst_160 : f32 to vector<8x128xf32>
    %440 = arith.addf %439, %438 : vector<8x128xf32>
    %441 = arith.divf %439, %440 : vector<8x128xf32>
    %cst_161 = arith.constant dense<0.000000e+00> : vector<8x128xf32>
    %442 = tpu.matmul %441, %5, %cst_161 {dimension_numbers = #tpu.dot_dimension_numbers<[1], [0], [0], [1], [0, 0, 1, 1], [], []>} : vector<8x128xf32>, vector<128x128xf32>, vector<8x128xf32> -> vector<8x128xf32>
    %443 = arith.addf %442, %14 : vector<8x128xf32>
    %444 = arith.addf %443, %441 : vector<8x128xf32>
    %445 = arith.negf %444 : vector<8x128xf32>
    %446 = math.exp %445 : vector<8x128xf32>
    %cst_162 = arith.constant 1.000000e+00 : f32
    %447 = vector.broadcast %cst_162 : f32 to vector<8x128xf32>
    %448 = arith.addf %447, %446 : vector<8x128xf32>
    %449 = arith.divf %447, %448 : vector<8x128xf32>
    %450 = arith.index_cast %c3_i32 : i32 to index
    %c0_163 = arith.constant 0 : index
    %c0_164 = arith.constant 0 : index
    %451 = vector.load %arg9[%450, %c0_163, %c0_164] : memref<4x8x128xf32, #tpu.memory_space<vmem>>, vector<1x8x128xf32>
    %452 = vector.shape_cast %451 : vector<1x8x128xf32> to vector<8x128xf32>
    %453 = vector.shape_cast %449 : vector<8x128xf32> to vector<1x8x128xf32>
    tpu.vector_store %arg9[%450, %c0_163, %c0_164], %453 {strides = array<i32>} : memref<4x8x128xf32, #tpu.memory_space<vmem>>, vector<1x8x128xf32>,
    %c1_i32_165 = arith.constant 1 : i32
    %454 = arith.addi %350, %c1_i32_165 : i32
    %c15_i32_166 = arith.constant 15 : i32
    %455 = arith.andi %454, %c15_i32_166 : i32
    %456 = arith.index_cast %455 : i32 to index
    %c0_167 = arith.constant 0 : index
    %c0_168 = arith.constant 0 : index
    %457 = vector.load %arg10[%456, %c0_167, %c0_168] : memref<16x8x128xf32, #tpu.memory_space<vmem>>, vector<1x8x128xf32>
    %458 = vector.shape_cast %457 : vector<1x8x128xf32> to vector<8x128xf32>
    %459 = vector.shape_cast %441 : vector<8x128xf32> to vector<1x8x128xf32>
    tpu.vector_store %arg10[%456, %c0_167, %c0_168], %459 {strides = array<i32>} : memref<16x8x128xf32, #tpu.memory_space<vmem>>, vector<1x8x128xf32>,
    %c4_i32_169 = arith.constant 4 : i32
    return
  }
  func.func @transform_0(%arg0: i32, %arg1: i32) -> (i32, i32, i32) {
    %c0_i32 = arith.constant 0 : i32
    %c0_i32_0 = arith.constant 0 : i32
    return %arg1, %arg0, %c0_i32 : i32, i32, i32
  }
  func.func @transform_1(%arg0: i32, %arg1: i32) -> (i32, i32) {
    %c0_i32 = arith.constant 0 : i32
    %c0_i32_0 = arith.constant 0 : i32
    %c0_i32_1 = arith.constant 0 : i32
    return %c0_i32, %c0_i32_0 : i32, i32
  }
  func.func @transform_2(%arg0: i32, %arg1: i32) -> (i32, i32) {
    %c0_i32 = arith.constant 0 : i32
    %c0_i32_0 = arith.constant 0 : i32
    %c0_i32_1 = arith.constant 0 : i32
    return %c0_i32, %c0_i32_0 : i32, i32
  }
  func.func @transform_3(%arg0: i32, %arg1: i32) -> (i32, i32) {
    %c0_i32 = arith.constant 0 : i32
    %c0_i32_0 = arith.constant 0 : i32
    %c0_i32_1 = arith.constant 0 : i32
    return %c0_i32, %c0_i32_0 : i32, i32
  }
  func.func @transform_4(%arg0: i32, %arg1: i32) -> (i32, i32) {
    %c0_i32 = arith.constant 0 : i32
    %c0_i32_0 = arith.constant 0 : i32
    %c0_i32_1 = arith.constant 0 : i32
    return %c0_i32, %c0_i32_0 : i32, i32
  }
  func.func @transform_5(%arg0: i32, %arg1: i32) -> (i32, i32) {
    %c0_i32 = arith.constant 0 : i32
    %c0_i32_0 = arith.constant 0 : i32
    %c0_i32_1 = arith.constant 0 : i32
    return %c0_i32, %c0_i32_0 : i32, i32
  }
  func.func @transform_6(%arg0: i32, %arg1: i32) -> (i32, i32) {
    %c0_i32 = arith.constant 0 : i32
    %c0_i32_0 = arith.constant 0 : i32
    %c0_i32_1 = arith.constant 0 : i32
    return %c0_i32, %c0_i32_0 : i32, i32
  }
  func.func @transform_7(%arg0: i32, %arg1: i32) -> (i32, i32, i32) {
    %c0_i32 = arith.constant 0 : i32
    %c0_i32_0 = arith.constant 0 : i32
    return %arg1, %arg0, %c0_i32 : i32, i32, i32
  }
}

</mosaic_0001>

<bundles_post_ra>
// kernel: tpu_custom_call.1
= control target key start
LH: loop header
LB: loop body
LE: loop exit
PB: predicated region body
PF: predicated region fallthrough
CT: control target
= control target key end

     0   :  { %s3855_s0 = inlined_call_operand.hbm [shape: f32[8,8,128], index: 0, kind: input, shape index: {}]   ;;  %s3856_s1 = inlined_call_operand.hbm [shape: f32[128,128], index: 1, kind: input, shape index: {}]   ;;  %s3857_s2 = inlined_call_operand.vmem [shape: f32[1,128], index: 2, kind: input, shape index: {}]   ;;  %s3858_s3 = inlined_call_operand.hbm [shape: f32[128,256], index: 3, kind: input, shape index: {}]   ;;  %s3859_s4 = inlined_call_operand.vmem [shape: f32[1,256], index: 4, kind: input, shape index: {}]   ;;  %s3860_s5 = inlined_call_operand.hbm [shape: f32[128,128], index: 5, kind: input, shape index: {}]   ;;  %s3861_s6 = inlined_call_operand.vmem [shape: f32[1,128], index: 6, kind: input, shape index: {}]   ;;  %s3862_s7 = inlined_call_operand.hbm [shape: f32[8,8,128], index: 7, kind: output, shape index: {}]  }
   0x1   :  { %3874 = sst [smem:[#allocation18_spill]] %s3856_s1 }
   0x2   :  { %3875 = sst [smem:[#allocation19_spill]] %s3862_s7 }
   0x3   :  { %12 = vsyncpa [#allocation4], 0 }
   0x4   :  { %14 = vsyncpa [#allocation4 + $0x1], 0 }
   0x5   :  { %15 = vsyncpa [#allocation7], 0 }
   0x6   :  { %16 = vsyncpa [#allocation10], 0 }
   0x7   :  { %17 = vsyncpa [#allocation5], 0 }
   0x8   :  { %19 = vsyncpa [#allocation5 + $0x1], 0  ;;  %s3095_s24 = smov 0   ;;  %s3097_s25 = smov 0  }
   0x9   :  { %s3099_s26 = smov 0   ;;  %s3101_s27 = smov 0  }
   0xa   :  { %s3103_s28 = smov 0   ;;  %s3105_s29 = smov 0  }
   0xb LB: > { %3876 = sst [smem:[#allocation16_spill]] %s3018_s24  ;;  %s1866_s30 = sadd.s32 4294967295, %s3038_s29   ;;  %s3038_s29 = sphi %s3105_s29, %s25_s29   ;;  %s3034_s28 = sphi %s3103_s28, %s3906_s28   ;;  %s3030_s27 = sphi %s3101_s27, %s3905_s27   ;;  %s3026_s26 = sphi %s3099_s26, %s3904_s26   ;;  %s3022_s25 = sphi %s3097_s25, %s3903_s25   ;;  %s3018_s24 = sphi %s3095_s24, %s3902_s24  }
   0xc   : > { %s1867_s8 = sadd.s32 4294967294, %s3038_s29   ;;  %p59_p0 = scmp.ne.s32.totalorder %s3022_s25, %s3018_s24 }
   0xd   : > { %p3129_p1 = scmp.eq.s32.totalorder %s1866_s30, 0  ;;  %p3133_p2 = scmp.eq.s32.totalorder %s1866_s30, 1 }
   0xe   : > { %p217_p3 = scmp.eq.s32.totalorder %s1867_s8, 1  ;;  %p1868_p5 = scmp.ge.s32.totalorder %s3038_s29, 1 }
   0xf   : > { %s3877_s9 = scalar_select %p3129_p1, 1, 0 }
  0x10   : > { %s3878_s10 = scalar_select %p3133_p2, 1, 0 }
  0x11   : > { %p3139_p4 = por %p3129_p1, %p59_p0  ;;  %p3144_p6 = por %p217_p3, %p59_p0 }
  0x12   : > { %p224_p7 = scmp.lt.s32.totalorder %s3038_s29, 3  ;;  %s3040_s14 = smov [#allocation6]  }
  0x13   : > { %s3879_s11 = scalar_select %p3139_p4, 1, 0 }
  0x14   : > { %s3880_s12 = scalar_select %p3144_p6, 1, 0 }
  0x15   : > { %p3149_p8 = pnand %p1868_p5, %p224_p7  ;;  %s236_s15 = sshll.u32 %s3040_s14, 4  ;;  %s3153_s15 = int_to_ptr.vmem [resolvable:$true] %s236_s15 }
  0x16   : > { %3881 = sst [smem:[#allocation17_spill]] %s3880_s12  ;;  %s3041_s17 = smov [#allocation8]  }
  0x17   : > { %s3882_s13 = scalar_select %p3149_p8, 1, 0 }
  0x18   : > { %p2674_p9 = pneg %p3149_p8  ;;  %s252_s18 = sshll.u32 %s3041_s17, 4  ;;  %s3164_s18 = int_to_ptr.vmem [resolvable:$true] %s252_s18 }
  0x19   : > { %s3884_s1 = sld [smem:[#allocation18_spill]] }
  0x1a   : > { %p3160_p11 = pnand %p2674_p9, %p3129_p1 }
  0x1c   : > { %p3174_p13 = pneg %p3160_p11 }
  0x1f   : > { %s2834_s21 = scalar_lea.hbm %s3884_s1, 2048 }
  0x20   : > { %p2835_p12 = scmp.ne.s32.totalorder %s3884_s1, %s2834_s21  ;;  %p2841_p5 = scmp.lt.u32.totalorder %s2834_s21, %s3884_s1 }
  0x22   : > { %p2837_p0 = pnand %p3174_p13, %p2835_p12 }
  0x24   : > { %p2838_p3 = pneg %p2837_p0 }
  0x26   : > { %p2843_p7 = pnand %p2841_p5, %p2838_p3 }
  0x28   : > { %2846 = shalt.err (!%p2843_p7)
}
  0x29   : > { %s2847_s17 = scalar_lea.vmem %s3153_s15, 2048  ;;  %p2855_p1 = scmp.lt.s32.totalorder %s3153_s15, %s3153_s15 }
  0x2a   : > { %p2848_p9 = scmp.ne.s32.totalorder %s3153_s15, %s2847_s17  ;;  %p2856_p4 = scmp.lt.s32.totalorder %s2847_s17, %s2847_s17 }
  0x2c   : > { %p2850_p10 = pnand %p2848_p9, %p3174_p13  ;;  %p2857_p12 = por %p2856_p4, %p2855_p1 }
  0x2e   : > { %p2851_p6 = pneg %p2850_p10 }
  0x30   : > { %p2858_p0 = pnand %p2857_p12, %p2851_p6 }
  0x32   : > { %2861 = shalt.err (!%p2858_p0)
}
  0x33   : > { %s3869_s19 = smov 128   ;;  %s3871_s20 = smov 8  }
  0x34   : > { %2677 = dma.hbm_to_vmem [thread:$0]  (!%p3160_p11), %s3884_s1, 2048, %s3153_s15, [#allocation7], %s3869_s19, %s3869_s19, %s3871_s20  }
  0x35   : > { %s2862_s14 = scalar_lea.hbm %s3858_s3, 4096 }
  0x36   : > { %p2863_p1 = scmp.ne.s32.totalorder %s3858_s3, %s2862_s14  ;;  %p2869_p10 = scmp.lt.u32.totalorder %s2862_s14, %s3858_s3 }
  0x38   : > { %p2865_p4 = pnand %p2863_p1, %p3174_p13 }
  0x3a   : > { %p2866_p6 = pneg %p2865_p4 }
  0x3c   : > { %p2871_p3 = pnand %p2869_p10, %p2866_p6 }
  0x3e   : > { %2874 = shalt.err (!%p2871_p3)
}
  0x3f   : > { %s2875_s15 = scalar_lea.vmem %s3164_s18, 4096  ;;  %p2883_p12 = scmp.lt.s32.totalorder %s3164_s18, %s3164_s18 }
  0x40   : > { %p2876_p5 = scmp.ne.s32.totalorder %s3164_s18, %s2875_s15  ;;  %p2884_p0 = scmp.lt.s32.totalorder %s2875_s15, %s2875_s15 }
  0x42   : > { %p2878_p7 = pnand %p2876_p5, %p3174_p13  ;;  %p2885_p1 = por %p2884_p0, %p2883_p12 }
  0x44   : > { %p2879_p9 = pneg %p2878_p7 }
  0x46   : > { %p2886_p4 = pnand %p2885_p1, %p2879_p9 }
  0x48   : > { %2889 = shalt.err (!%p2886_p4)
}
  0x49   : > { %s3044_s12 = smov 256   ;;  %s3045_s7 = smov 16  }
  0x4a   : > { %2680 = dma.hbm_to_vmem [thread:$0]  (!%p3160_p11), %s3858_s3, 4096, %s3164_s18, [#allocation7], %s3044_s12, %s3044_s12, %s3045_s7  }
  0x4b   : > { %s3046_s22 = smov [#allocation9]   ;;  %s2890_s17 = scalar_lea.hbm %s3860_s5, 2048 }
  0x4c   : > { %s268_s23 = sshll.u32 %s3046_s22, 4  ;;  %p2891_p6 = scmp.ne.s32.totalorder %s3860_s5, %s2890_s17  ;;  %s269_s23 = int_to_ptr.vmem [resolvable:$true] %s268_s23 }
  0x4d   : > { %p2897_p5 = scmp.lt.u32.totalorder %s2890_s17, %s3860_s5 }
  0x4e   : > { %p2893_p10 = pnand %p2891_p6, %p3174_p13 }
  0x50   : > { %p2894_p3 = pneg %p2893_p10 }
  0x52   : > { %p2899_p7 = pnand %p2897_p5, %p2894_p3 }
  0x54   : > { %2902 = shalt.err (!%p2899_p7)
}
  0x55   : > { %s2903_s18 = scalar_lea.vmem %s269_s23, 2048  ;;  %p2911_p1 = scmp.lt.s32.totalorder %s269_s23, %s269_s23 }
  0x56   : > { %p2904_p9 = scmp.ne.s32.totalorder %s269_s23, %s2903_s18  ;;  %p2912_p4 = scmp.lt.s32.totalorder %s2903_s18, %s2903_s18 }
  0x58   : > { %p2906_p12 = pnand %p2904_p9, %p3174_p13  ;;  %p2913_p8 = por %p2912_p4, %p2911_p1 }
  0x5a   : > { %p2907_p0 = pneg %p2906_p12 }
  0x5c   : > { %p2914_p2 = pnand %p2913_p8, %p2907_p0 }
  0x5e   : > { %2917 = shalt.err (!%p2914_p2)
}
  0x5f   : > { %s3886_s19 = smov 8   ;;  %s3887_s12 = smov 128  }
  0x60   : > { %2683 = dma.hbm_to_vmem [thread:$0]  (!%p3160_p11), %s3860_s5, 2048, %s269_s23, [#allocation10], %s3887_s12, %s3887_s12, %s3886_s19  }
  0x61   : > { %s34_s30 = sadd.s32 1, %s3034_s28  ;;  %s46_s16 = sadd.s32 1, %s3026_s26 }
  0x62   : > { %p35_p2 = scmp.ge.s32.totalorder %s34_s30, 2  ;;  %p53_p8 = scmp.ne.s32.totalorder %s3026_s26, %s3022_s25 }
  0x63   : > { %p54_p13 = scmp.eq.s32.totalorder %s3038_s29, 0  ;;  %p3889_p10 = scmp.ne.s32.totalorder %s3878_s10, 0 }
  0x64   : > { %s3908_s30 = smov (%p35_p2, %s34_s30), 0  ;;  %p2695_p11 = scmp.lt.s32.totalorder %s3038_s29, 2 }
  0x65   : > { %p3249_p6 = por %p54_p13, %p53_p8  ;;  %p3255_p3 = por %p3889_p10, %p53_p8 }
  0x66   : > { %s41_s21 = ssub.s32 %s3034_s28, %s3908_s30  ;;  %s285_s22 = sand.u32 1, %s3026_s26  }
  0x67   : > { %p44_p5 = scmp.eq.s32.totalorder %s41_s21, 0  ;;  %s1873_s23 = sshll.u32 %s285_s22, 5 }
  0x68   : > { %s1920_s14 = sshll.u32 %s3034_s28, 9  ;;  %s289_s10 = scalar_lea.vmem [#allocation3], %s1873_s23 }
  0x69   : > { %s3264_s8 = scalar_select %p44_p5, %s3026_s26, %s46_s16  }
  0x6a   : > { %s3270_s18 = scalar_lea.hbm %s3855_s0, %s1920_s14  ;;  %s297_s1 = sshll.u32 %s289_s10, 4  ;;  %s3272_s1 = int_to_ptr.vmem [resolvable:$true] %s297_s1 }
  0x6b   : > { %p3276_p7 = pnand %p2695_p11, %p3249_p6  ;;  %s3280_s16 = scalar_lea.sflag [#allocation4], %s285_s22 }
  0x6c   : > { %s2918_s21 = scalar_lea.hbm %s3270_s18, 512  ;;  %s2923_s7 = scalar_lea.hbm %s3855_s0, 1024 }
  0x6d   : > { %p2919_p9 = scmp.ne.s32.totalorder %s3270_s18, %s2918_s21  ;;  %p2920_p12 = pneg %p3276_p7 }
  0x6e   : > { %p2924_p4 = scmp.lt.u32.totalorder %s3270_s18, %s3855_s0  ;;  %p2925_p2 = scmp.lt.u32.totalorder %s2923_s7, %s2918_s21 }
  0x6f   : > { %p2921_p0 = pnand %p2920_p12, %p2919_p9  ;;  %p2927_p13 = scmp.lt.u32.totalorder %s2918_s21, %s3270_s18 }
  0x70   : > { %p2926_p8 = por %p2925_p2, %p2924_p4 }
  0x71   : > { %p2922_p1 = pneg %p2921_p0 }
  0x72   : > { %p2928_p6 = por %p2927_p13, %p2926_p8 }
  0x74   : > { %p2929_p10 = pnand %p2928_p6, %p2922_p1 }
  0x76   : > { %2932 = shalt.err (!%p2929_p10)
}
  0x77   : > { %s2933_s22 = scalar_lea.vmem %s3272_s1, 512  ;;  %s3047_s10 = smov [#allocation3]  }
  0x78   : > { %p2934_p11 = scmp.ne.s32.totalorder %s3272_s1, %s2933_s22  ;;  %s2938_s23 = sshll.u32 %s3047_s10, 4  ;;  %s2939_s23 = int_to_ptr.vmem [resolvable:$false] %s2938_s23 }
  0x79   : > { %s2940_s14 = scalar_lea.vmem %s2939_s23, 1024  ;;  %p2941_p0 = scmp.lt.s32.totalorder %s3272_s1, %s2939_s23 }
  0x7a   : > { %p2936_p5 = pnand %p2934_p11, %p2920_p12  ;;  %p2942_p4 = scmp.lt.s32.totalorder %s2940_s14, %s2933_s22 }
  0x7c   : > { %p2937_p9 = pneg %p2936_p5  ;;  %p2943_p2 = por %p2942_p4, %p2941_p0 }
  0x7e   : > { %p2944_p8 = pnand %p2943_p2, %p2937_p9 }
  0x80   : > { %2947 = shalt.err (!%p2944_p8)
}
  0x81   : > { %2687 = dma.hbm_to_vmem [thread:$0]  (!%p3276_p7), %s3270_s18, 512, %s3272_s1, %s3280_s16, %s3887_s12, %s3887_s12, %s3886_s19  }
  0x82   : > { %p3892_p12 = scmp.ne.s32.totalorder %s3882_s13, 0 }
  0x83   : > { %s3314_s21 = sand.u32 (!%p3892_p12), 1, %s3022_s25   ;;  %p3893_p1 = scmp.ne.s32.totalorder (!%p3892_p12), %s3879_s11, 0 }
  0x84   : > { %309 = sbr.rel (%p3892_p12) target bundleno = 2290 (0x8f2), region = 48  ;;  %s1877_s7 = sshll.u32 (!%p3892_p12), %s3314_s21, 5 }
  0x85   : > { %s312_s17 = scalar_lea.sflag (!%p3892_p12), [#allocation4], %s3314_s21  ;;  %s3318_s15 = scalar_lea.vmem (!%p3892_p12), [#allocation3], %s1877_s7 }
  0x8b   : > { %3001 = dma.done.wait (%p3893_p1), %s312_s17, 512  }
  0x8c   : > { %3003 = vsyncadd (%p3893_p1), %s312_s17, 4294966784  ;;  %p3894_p7 = scmp.ne.s32.totalorder %s3877_s9, 0 }
  0x8e   : > { %3005 = dma.done.wait (%p3894_p7), [#allocation7], 6144  }
  0x8f   : > { %3007 = vsyncadd (%p3894_p7), [#allocation7], 4294961152 }
  0x90   : > { %3009 = dma.done.wait (%p3894_p7), [#allocation10], 2048  }
  0x91   : > { %3011 = vsyncadd (%p3894_p7), [#allocation10], 4294965248  ;;  %s3332_s13 = scalar_lea.vmem [#allocation11], %s1877_s7  ;;  %p1882_p13 = scmp.ne.s32.totalorder %s3030_s27, 0 }
  0x92   : > { %v3048_v0 = vmov (!%p1882_p13), 0.0  }
  0x93   : > { %363 = sbr.rel (%p1882_p13) target bundleno = 154 (0x9a), region = 68  ;;  %364 = vst [vmem:[#allocation2] sm:$0xff] (!%p1882_p13), %v3048_v0 }
  0x9a PF: > { %v382_v1 = vld [vmem:[#allocation8 + $0x8] sm:$0xff]  ;;  %v384_v2 = vld [vmem:[#allocation8 + $0x18] sm:$0xff]  ;;  %v365_v3 = vld [vmem:[#allocation6] sm:$0xff]  ;;  %v3049_v4 = vmov 0.0|0.0   ;;  %vm3050_vm0 = vmmov 0   ;;  %v3051_v9 = vmov 0.0  }
  0x9b   : > { %2338 = vmatprep.subr.bf16.mxu0 %v3049_v4  ;;  %v3336_v5 = vpack.c.bf16 %v384_v2, %v382_v1  ;;  %v366_v6 = vld [vmem:[#allocation6 + $0x8] sm:$0xff]  ;;  %v381_v7 = vld [vmem:[#allocation8] sm:$0xff]  ;;  %v383_v8 = vld [vmem:[#allocation8 + $0x10] sm:$0xff]  ;;  %2090 = vmatprep.mubr.msk.f32.mxu0 %vm3050_vm0, %v3051_v9  ;;  %s3379_s9 = sshll.u32 %s3030_s27, 2 }
  0x9c   : > { %v3340_v10 = vpack.c.bf16 %v366_v6, %v365_v3  ;;  %v3342_v11 = vpack.c.bf16 %v383_v8, %v381_v7  ;;  %v386_v12 = vld [vmem:[#allocation8 + $0x28] sm:$0xff]  ;;  %v388_v13 = vld [vmem:[#allocation8 + $0x38] sm:$0xff]  ;;  %v367_v14 = vld [vmem:[#allocation6 + $0x10] sm:$0xff]  ;;  %616 = vmatprep.mubr.f32.mxu1 %v3051_v9  ;;  %s531_s11 = sadd.s32 4294967295, %s3379_s9  ;;  %s538_s12 = sadd.s32 4294967293, %s3379_s9 }
  0x9d   : > { %2363 = vmatprep.subr.bf16.mxu1 %v3336_v5  ;;  %v3346_v15 = vpack.c.bf16 %v388_v13, %v386_v12  ;;  %v368_v16 = vld [vmem:[#allocation6 + $0x18] sm:$0xff]  ;;  %v385_v17 = vld [vmem:[#allocation8 + $0x20] sm:$0xff]  ;;  %v387_v18 = vld [vmem:[#allocation8 + $0x30] sm:$0xff]  ;;  %p3392_p6 = scmp.gt.s32.totalorder %s531_s11, 0  ;;  %s456_s18 = sand.u32 15, %s3379_s9 }
  0x9e   : > { %2340 = vmatpush3.bf16.msra.mxu0 %v3340_v10  ;;  %2365 = vmatpush1.bf16.msra.mxu1 %v3342_v11  ;;  %v3350_v19 = vpack.c.bf16 %v368_v16, %v367_v14  ;;  %v3352_v20 = vpack.c.bf16 %v387_v18, %v385_v17  ;;  %v390_v21 = vld [vmem:[#allocation8 + $0x48] sm:$0xff]  ;;  %v392_v22 = vld [vmem:[#allocation8 + $0x58] sm:$0xff]  ;;  %v369_v23 = vld [vmem:[#allocation6 + $0x20] sm:$0xff]  ;;  %p3410_p10 = scmp.gt.s32.totalorder %s538_s12, 0  ;;  %s545_s20 = sadd.s32 4294967289, %s3379_s9 }
  0x9f   : > { %2341 = vmatprep.subr.bf16.mxu0 %v3049_v4  ;;  %2367 = vmatprep.subr.bf16.mxu1 %v3346_v15  ;;  %v3356_v24 = vpack.c.bf16 %v392_v22, %v390_v21  ;;  %v370_v25 = vld [vmem:[#allocation6 + $0x28] sm:$0xff]  ;;  %v389_v26 = vld [vmem:[#allocation8 + $0x40] sm:$0xff]  ;;  %v391_v27 = vld [vmem:[#allocation8 + $0x50] sm:$0xff]  ;;  %s3910_s11 = smov (!%p3392_p6, %s531_s11), 0  ;;  %s1886_s16 = sshll.u32 %s456_s18, 3 }
  0xa0   : > { %v394_v28 = vld [vmem:[#allocation8 + $0x68] sm:$0xff]  ;;  %v396_v29 = vld [vmem:[#allocation8 + $0x78] sm:$0xff]  ;;  %v3360_v30 = vpack.c.bf16 %v370_v25, %v369_v23  ;;  %v3362_v31 = vpack.c.bf16 %v391_v27, %v389_v26  ;;  %v371_v32 = vld [vmem:[#allocation6 + $0x30] sm:$0xff]  ;;  %s3912_s12 = smov (!%p3410_p10, %s538_s12), 0  ;;  %s534_s22 = sand.u32 15, %s3910_s11  ;;  %v438_v25 = vlaneseq }
  0xa1   : > { %v3366_v33 = vpack.c.bf16 %v396_v29, %v394_v28  ;;  %v372_v34 = vld [vmem:[#allocation6 + $0x38] sm:$0xff]  ;;  %v393_v35 = vld [vmem:[#allocation8 + $0x60] sm:$0xff]  ;;  %v395_v36 = vld [vmem:[#allocation8 + $0x70] sm:$0xff]  ;;  %p546_p11 = scmp.gt.s32.totalorder %s545_s20, 0  ;;  %s3439_s10 = sshll.u32 %s534_s22, 3 }
  0xa2   : > { %2343 = vmatpush3.bf16.msra.mxu0 %v3350_v19  ;;  %2369 = vmatpush1.bf16.msra.mxu1 %v3352_v20  ;;  %v398_v37 = vld [vmem:[#allocation8 + $0x88] sm:$0xff]  ;;  %v400_v38 = vld [vmem:[#allocation8 + $0x98] sm:$0xff]  ;;  %v3370_v39 = vpack.c.bf16 %v372_v34, %v371_v32  ;;  %v3372_v40 = vpack.c.bf16 %v395_v36, %v393_v35  ;;  %v373_v41 = vld [vmem:[#allocation6 + $0x40] sm:$0xff]  ;;  %s541_s23 = sand.u32 15, %s3912_s12  ;;  %s458_s14 = scalar_lea.vmem [#allocation2], %s1886_s16  ;;  %v439_v26 = vshrl.u32 %v438_v25, 7 }
  0xa3   : > { %2344 = vmatprep.subr.bf16.mxu0 %v3049_v4  ;;  %2371 = vmatprep.subr.bf16.mxu1 %v3356_v24  ;;  %v3376_v42 = vpack.c.bf16 %v400_v38, %v398_v37  ;;  %v374_v43 = vld [vmem:[#allocation6 + $0x48] sm:$0xff]  ;;  %v397_v44 = vld [vmem:[#allocation8 + $0x80] sm:$0xff]  ;;  %v399_v45 = vld [vmem:[#allocation8 + $0x90] sm:$0xff]  ;;  %s3914_s20 = smov (!%p546_p11, %s545_s20), 0  ;;  %s1888_s7 = sshll.u32 %s541_s23, 3 }
  0xa4   : > { %v402_v46 = vld [vmem:[#allocation8 + $0xa8] sm:$0xff]  ;;  %v404_v47 = vld [vmem:[#allocation8 + $0xb8] sm:$0xff]  ;;  %v3383_v48 = vpack.c.bf16 %v374_v43, %v373_v41  ;;  %v3385_v49 = vpack.c.bf16 %v399_v45, %v397_v44  ;;  %v375_v50 = vld [vmem:[#allocation6 + $0x50] sm:$0xff]  ;;  %s548_s17 = sand.u32 15, %s3914_s20  ;;  %s536_s11 = scalar_lea.vmem [#allocation2], %s3439_s10  ;;  %v444_v28 = vsub.s32 1, %v439_v26 }
  0xa5   : > { %v3390_v51 = vpack.c.bf16 %v404_v47, %v402_v46  ;;  %v376_v52 = vld [vmem:[#allocation6 + $0x58] sm:$0xff]  ;;  %v401_v53 = vld [vmem:[#allocation8 + $0xa0] sm:$0xff]  ;;  %v403_v54 = vld [vmem:[#allocation8 + $0xb0] sm:$0xff]  ;;  %s1889_s19 = sshll.u32 %s548_s17, 3  ;;  %s543_s12 = scalar_lea.vmem [#allocation2], %s1888_s7  ;;  %v440_v32 = vsub.s32 0, %v439_v26 }
  0xa6   : > { %2346 = vmatpush3.bf16.msra.mxu0 %v3360_v30  ;;  %2373 = vmatpush1.bf16.msra.mxu1 %v3362_v31  ;;  %v406_v55 = vld [vmem:[#allocation8 + $0xc8] sm:$0xff]  ;;  %v408_v56 = vld [vmem:[#allocation8 + $0xd8] sm:$0xff]  ;;  %v3399_v57 = vpack.c.bf16 %v376_v52, %v375_v50  ;;  %v3401_v58 = vpack.c.bf16 %v403_v54, %v401_v53  ;;  %v377_v59 = vld [vmem:[#allocation6 + $0x60] sm:$0xff]  ;;  %s550_s18 = scalar_lea.vmem [#allocation2], %s1889_s19  ;;  %s3564_s23 = sadd.s32 1, %s3379_s9 }
  0xa7   : > { %2347 = vmatprep.subr.bf16.mxu0 %v3049_v4  ;;  %2375 = vmatprep.subr.bf16.mxu1 %v3366_v33  ;;  %v3405_v60 = vpack.c.bf16 %v408_v56, %v406_v55  ;;  %v378_v61 = vld [vmem:[#allocation6 + $0x68] sm:$0xff]  ;;  %v405_v62 = vld [vmem:[#allocation8 + $0xc0] sm:$0xff]  ;;  %v407_v63 = vld [vmem:[#allocation8 + $0xd0] sm:$0xff]  ;;  %p846_p5 = scmp.gt.s32.totalorder %s3379_s9, 0  ;;  %s852_s19 = sadd.s32 4294967294, %s3379_s9 }
  0xa8   : > { %v410_v0 = vld [vmem:[#allocation8 + $0xe8] sm:$0xff]  ;;  %v412_v1 = vld [vmem:[#allocation8 + $0xf8] sm:$0xff]  ;;  %v3418_v2 = vpack.c.bf16 %v378_v61, %v377_v59  ;;  %v3420_v3 = vpack.c.bf16 %v407_v63, %v405_v62  ;;  %v379_v6 = vld [vmem:[#allocation6 + $0x70] sm:$0xff]  ;;  %p853_p9 = scmp.gt.s32.totalorder %s852_s19, 0  ;;  %p1161_p4 = scmp.gt.s32.totalorder %s3564_s23, 0 }
  0xa9   : > { %v3425_v7 = vpack.c.bf16 %v412_v1, %v410_v0  ;;  %v380_v8 = vld [vmem:[#allocation6 + $0x78] sm:$0xff]  ;;  %v409_v12 = vld [vmem:[#allocation8 + $0xe0] sm:$0xff]  ;;  %v411_v13 = vld [vmem:[#allocation8 + $0xf0] sm:$0xff] }
  0xaa   : > { %2349 = vmatpush3.bf16.msra.mxu0 %v3370_v39  ;;  %2377 = vmatpush1.bf16.msra.mxu1 %v3372_v40  ;;  %v3433_v14 = vpack.c.bf16 %v380_v8, %v379_v6  ;;  %v3435_v16 = vpack.c.bf16 %v411_v13, %v409_v12  ;;  %v460_v17 = vld [vmem:[%s3318_s15] sm:$0xff]  ;;  %v414_v1 = vld [vmem:[#allocation9 + $0x8] sm:$0xff]  ;;  %v415_v8 = vld [vmem:[#allocation9 + $0x10] sm:$0xff]  ;;  %s3916_s19 = smov (!%p853_p9, %s852_s19), 0 }
  0xab   : > { %2350 = vmatprep.subr.bf16.mxu0 %v3049_v4  ;;  %2379 = vmatprep.subr.bf16.mxu1 %v3376_v42  ;;  %v459_v18 = vld [vmem:[%s458_s14] sm:$0xff]  ;;  %v416_v12 = vld [vmem:[#allocation9 + $0x18] sm:$0xff]  ;;  %s770_s14 = sand.u32 15, %s3564_s23  ;;  %s855_s16 = sand.u32 15, %s3916_s19 }
  0xac   : > { %v537_v21 = vld [vmem:[%s536_s11] sm:$0xff]  ;;  %v3507_v13 = vpack.c.bf16 %v416_v12, %v415_v8  ;;  %s1892_s7 = sshll.u32 %s770_s14, 3  ;;  %s1895_s22 = sshll.u32 %s855_s16, 3 }
  0xad   : > { %v544_v22 = vld [vmem:[%s543_s12] sm:$0xff]  ;;  %s772_s17 = scalar_lea.vmem [#allocation2], %s1892_s7  ;;  %s857_s19 = scalar_lea.vmem [#allocation2], %s1895_s22 }
  0xae   : > { %2352 = vmatpush3.bf16.msra.mxu0 %v3383_v48  ;;  %2381 = vmatpush1.bf16.msra.mxu1 %v3385_v49  ;;  %v551_v23 = vld [vmem:[%s550_s18] sm:$0xff]  ;;  %s847_s12 = scalar_select %p846_p5, %s3379_s9, 0 }
  0xaf   : > { %2353 = vmatprep.subr.bf16.mxu0 %v3049_v4  ;;  %2383 = vmatprep.subr.bf16.mxu1 %v3390_v51  ;;  %v436_v27 = vld [vmem:[%s3859_s4] sm:$0x3]  ;;  %s859_s18 = sadd.s32 4294967290, %s3379_s9  ;;  %s3663_s16 = sadd.s32 2, %s3379_s9 }
  0xb0   : > { %v3475_v29 = vrot.slane %v436_v27, %v444_v28  ;;  %v3477_v34 = vrot.slane %v436_v27, %v440_v32  ;;  %v3482_v35 = vld [vmem:[%s3857_s2] ss:$0 sm:$0xff]  ;;  %v422_v27 = vld [vmem:[#allocation9 + $0x48] sm:$0xff]  ;;  %v423_v32 = vld [vmem:[#allocation9 + $0x50] sm:$0xff]  ;;  %s848_s1 = sand.u32 15, %s847_s12  ;;  %p860_p0 = scmp.gt.s32.totalorder %s859_s18, 0 }
  0xb1   : > { %v413_v0 = vld [vmem:[#allocation9] sm:$0xff]  ;;  %s3591_s20 = sshll.u32 %s848_s1, 3  ;;  %s1085_s22 = sand.u32 15, %s3663_s16 }
  0xb2   : > { %2355 = vmatpush3.bf16.msra.mxu0 %v3399_v57  ;;  %2385 = vmatpush1.bf16.msra.mxu1 %v3401_v58  ;;  %v3503_v6 = vpack.c.bf16 %v414_v1, %v413_v0  ;;  %v421_v26 = vld [vmem:[#allocation9 + $0x40] sm:$0xff]  ;;  %s3918_s18 = smov (!%p860_p0, %s859_s18), 0  ;;  %s850_s7 = scalar_lea.vmem [#allocation2], %s3591_s20 }
  0xb3   : > { %2356 = vmatprep.subr.bf16.mxu0 %v3049_v4  ;;  %2387 = vmatprep.subr.bf16.mxu1 %v3405_v60  ;;  %v3519_v28 = vpack.c.bf16 %v422_v27, %v421_v26  ;;  %s862_s14 = sand.u32 15, %s3918_s18  ;;  %s3920_s23 = smov (!%p1161_p4, %s3564_s23), 0 }
  0xb4   : > { %p1470_p8 = scmp.gt.s32.totalorder %s3663_s16, 0 }
  0xb6   : > { %2358 = vmatpush3.bf16.msra.mxu0 %v3418_v2  ;;  %2389 = vmatpush1.bf16.msra.mxu1 %v3420_v3  ;;  %s3924_s16 = smov (!%p1470_p8, %s3663_s16), 0 }
  0xb7   : > { %2359 = vmatprep.subr.bf16.mxu0 %v3049_v4  ;;  %2391 = vmatprep.subr.bf16.mxu1 %v3425_v7 }
  0xba   : > { %2361 = vmatpush3.bf16.msra.mxu0 %v3433_v14  ;;  %2393 = vmatpush1.bf16.msra.mxu1 %v3435_v16 }
  0xbb   : > { %2394 = vmatprep.subr.bf16.mxu0 %v3049_v4  ;;  %2418 = vmatprep.subr.bf16.mxu1 %v3049_v4 }
  0xbd   : > { %2091 = vmatmul.mubr.f32.vlgmr.msra.gmra.mrb[0].mxu0 %v460_v17  ;;  %617 = vmatmul.mubr.f32.vlgmr.msra.gmra.mrb[0].mxu1 %v459_v18  ;;  %v417_v17 = vld [vmem:[#allocation9 + $0x20] sm:$0xff]  ;;  %v418_v18 = vld [vmem:[#allocation9 + $0x28] sm:$0xff] }
  0xbe   : > { %622 = vmatprep.mubr.f32.mxu1 %v3051_v9  ;;  %2125 = vmatprep.mubr.msk.f32.mxu0 %vm3050_vm0, %v3051_v9 }
  0xbf   : > { %2420 = vmatpush3.bf16.msra.mxu1 %v3340_v10  ;;  %2396 = vmatpush3.bf16.msra.mxu0 %v3503_v6 }
  0xc0   : > { %2421 = vmatprep.subr.bf16.mxu1 %v3049_v4  ;;  %2397 = vmatprep.subr.bf16.mxu0 %v3049_v4 }
  0xc1   : > { %623 = vmatmul.mubr.f32.gmra.mrb[2].mxu1 %v537_v21  ;;  %v3511_v21 = vpack.c.bf16 %v418_v18, %v417_v17 }
  0xc2   : > { %628 = vmatprep.mubr.f32.mxu1 %v3051_v9 }
  0xc3   : > { %2423 = vmatpush3.bf16.msra.mxu1 %v3350_v19  ;;  %2399 = vmatpush3.bf16.msra.mxu0 %v3507_v13 }
  0xc4   : > { %2424 = vmatprep.subr.bf16.mxu1 %v3049_v4  ;;  %2400 = vmatprep.subr.bf16.mxu0 %v3049_v4 }
  0xc5   : > { %629 = vmatmul.mubr.f32.gmra.mrb[4].mxu1 %v544_v22  ;;  %v419_v22 = vld [vmem:[#allocation9 + $0x30] sm:$0xff] }
  0xc6   : > { %634 = vmatprep.mubr.f32.mxu1 %v3051_v9 }
  0xc7   : > { %2426 = vmatpush3.bf16.msra.mxu1 %v3360_v30  ;;  %2402 = vmatpush3.bf16.msra.mxu0 %v3511_v21 }
  0xc8   : > { %2427 = vmatprep.subr.bf16.mxu1 %v3049_v4  ;;  %2403 = vmatprep.subr.bf16.mxu0 %v3049_v4 }
  0xc9   : > { %635 = vmatmul.mubr.f32.gmra.mrb[6].mxu1 %v551_v23  ;;  %v420_v23 = vld [vmem:[#allocation9 + $0x38] sm:$0xff] }
  0xca   : > { %2160 = vmatprep.mubr.msk.f32.mxu1 %vm3050_vm0, %v3051_v9  ;;  %v3515_v25 = vpack.c.bf16 %v420_v23, %v419_v22 }
  0xcb   : > { %2429 = vmatpush3.bf16.msra.mxu1 %v3370_v39 }
  0xcc   : > { %2430 = vmatprep.subr.bf16.mxu1 %v3049_v4  ;;  %2405 = vmatpush3.bf16.msra.mxu0 %v3515_v25 }
  0xcd   : > { %2406 = vmatprep.subr.bf16.mxu0 %v3049_v4 }
  0xcf   : > { %2432 = vmatpush3.bf16.msra.mxu1 %v3383_v48 }
  0xd0   : > { %2433 = vmatprep.subr.bf16.mxu1 %v3049_v4  ;;  %2408 = vmatpush3.bf16.msra.mxu0 %v3519_v28 }
  0xd1   : > { %2409 = vmatprep.subr.bf16.mxu0 %v3049_v4 }
  0xd3   : > { %2435 = vmatpush3.bf16.msra.mxu1 %v3399_v57 }
  0xd4   : > { %2436 = vmatprep.subr.bf16.mxu1 %v3049_v4 }
  0xd7   : > { %2438 = vmatpush3.bf16.msra.mxu1 %v3418_v2 }
  0xd8   : > { %2439 = vmatprep.subr.bf16.mxu1 %v3049_v4 }
  0xdb   : > { %2441 = vmatpush3.bf16.msra.mxu1 %v3433_v14 }
  0xdc   : > { %2474 = vmatprep.subr.bf16.mxu1 %v3049_v4 }
 0x190   : > { %v527_v36 = vpop.f32.mrb[0].mxu0  ;;  %v618_v37 = vpop.f32.mrb[0].mxu1 }
 0x191   : > { %v3485_v38 = vadd.f32 %v3482_v35, %v527_v36  ;;  %v619_v41 = vadd.f32 %v618_v37, %v3477_v34  ;;  %v3488_v43 = vpop.f32.mrb[1].mxu1  ;;  %v2092_v44 = vpop.f32.mrb[1].mxu0  ;;  %v424_v36 = vld [vmem:[#allocation9 + $0x58] sm:$0xff] }
 0x192   : > { %v3523_v37 = vpack.c.bf16 %v424_v36, %v423_v32  ;;  %v426_v44 = vld [vmem:[#allocation9 + $0x68] sm:$0xff] }
 0x193   : > { %v641_v45 = vmul.f32 %v619_v41, %v3485_v38  ;;  %v425_v41 = vld [vmem:[#allocation9 + $0x60] sm:$0xff] }
 0x194   : > { %v624_v46 = vpop.f32.mrb[2].mxu1  ;;  %2411 = vmatpush3.bf16.msra.mxu0 %v3523_v37 }
 0x195   : > { %v625_v47 = vadd.f32 %v624_v46, %v3477_v34  ;;  %v3492_v50 = vpop.f32.mrb[3].mxu1  ;;  %642 = vadd.xlane.f32.xlu0 %v641_v45  ;;  %v3526_v45 = vpack.c.bf16 %v426_v44, %v425_v41  ;;  %2412 = vmatprep.subr.bf16.mxu0 %v3049_v4  ;;  %v427_v46 = vld [vmem:[#allocation9 + $0x70] sm:$0xff] }
 0x197   : > { %v645_v52 = vmul.f32 %v625_v47, %v3485_v38  ;;  %v428_v47 = vld [vmem:[#allocation9 + $0x78] sm:$0xff] }
 0x198   : > { %v630_v53 = vpop.f32.mrb[4].mxu1  ;;  %2414 = vmatpush3.bf16.msra.mxu0 %v3526_v45 }
 0x199   : > { %v631_v54 = vadd.f32 %v630_v53, %v3477_v34  ;;  %v3496_v55 = vpop.f32.mrb[5].mxu1  ;;  %646 = vadd.xlane.f32.xlu0 %v645_v52  ;;  %v3530_v52 = vpack.c.bf16 %v428_v47, %v427_v46  ;;  %2415 = vmatprep.subr.bf16.mxu0 %v3049_v4  ;;  %v1893_v53 = vld [vmem:[%s3318_s15 + $0x8] sm:$0xff]  ;;  %v621_v46 = vadd.f32 %v3488_v43, %v3475_v29 }
 0x19a   : > { %2161 = vmatmul.mubr.f32.vlgmr.msra.gmra.mrb[8].mxu1 %v1893_v53  ;;  %v627_v53 = vadd.f32 %v3492_v50, %v3475_v29 }
 0x19b   : > { %v649_v56 = vmul.f32 %v631_v54, %v3485_v38  ;;  %2476 = vmatpush3.bf16.msra.mxu1 %v3503_v6  ;;  %2195 = vmatprep.mubr.msk.f32.mxu1 %vm3050_vm0, %v3051_v9 }
 0x19c   : > { %v636_v59 = vpop.f32.mrb[6].mxu1  ;;  %2417 = vmatpush3.bf16.msra.mxu0 %v3530_v52  ;;  %2477 = vmatprep.subr.bf16.mxu1 %v3049_v4 }
 0x19d   : > { %v637_v61 = vadd.f32 %v636_v59, %v3477_v34  ;;  %v3500_v62 = vpop.f32.mrb[7].mxu1  ;;  %650 = vadd.xlane.f32.xlu1 %v649_v56  ;;  %2443 = vmatprep.subr.bf16.mxu0 %v3336_v5 }
 0x19f   : > { %v653_v63 = vmul.f32 %v637_v61, %v3485_v38  ;;  %2479 = vmatpush3.bf16.msra.mxu1 %v3507_v13 }
 0x1a0   : > { %2480 = vmatprep.subr.bf16.mxu1 %v3049_v4 }
 0x1a1   : > { %654 = vadd.xlane.f32.xlu1 %v653_v63 }
 0x1a3   : > { %2482 = vmatpush3.bf16.msra.mxu1 %v3511_v21 }
 0x1a4   : > { %2483 = vmatprep.subr.bf16.mxu1 %v3049_v4 }
 0x1a7   : > { %2485 = vmatpush3.bf16.msra.mxu1 %v3515_v25 }
 0x1a8   : > { %2486 = vmatprep.subr.bf16.mxu1 %v3049_v4 }
 0x1ab   : > { %2488 = vmatpush3.bf16.msra.mxu1 %v3519_v28 }
 0x1ac   : > { %2489 = vmatprep.subr.bf16.mxu1 %v3049_v4 }
 0x1af   : > { %2491 = vmatpush3.bf16.msra.mxu1 %v3523_v37 }
 0x1b0   : > { %2492 = vmatprep.subr.bf16.mxu1 %v3049_v4 }
 0x1b3   : > { %2494 = vmatpush3.bf16.msra.mxu1 %v3526_v45 }
 0x1b4   : > { %2495 = vmatprep.subr.bf16.mxu1 %v3049_v4 }
 0x1b7   : > { %2497 = vmatpush3.bf16.msra.mxu1 %v3530_v52 }
 0x1b8   : > { %2523 = vmatprep.subr.bf16.mxu1 %v3336_v5 }
 0x222   : > { %v643_v54 = vpop.xlane.xlu0 %642 }
 0x223   : > { %v644_v63 = vmul.f32 0.17677669, %v643_v54 }
 0x226   : > { %v647_v56 = vpop.xlane.xlu0 %646 }
 0x227   : > { %v648_v59 = vmul.f32 0.17677669, %v647_v56 }
 0x229   : > { %v657_v1 = vmax.f32 %v644_v63, %v648_v59 }
 0x22a   : > { %v651_v61 = vpop.xlane.xlu1 %650 }
 0x22b   : > { %v652_v0 = vmul.f32 0.17677669, %v651_v61  ;;  %v633_v61 = vadd.f32 %v3496_v55, %v3475_v29 }
 0x22d   : > { %v658_v12 = vmax.f32 %v657_v1, %v652_v0 }
 0x22e   : > { %v655_v8 = vpop.xlane.xlu1 %654 }
 0x22f   : > { %v656_v17 = vmul.f32 0.17677669, %v655_v8  ;;  %v639_v8 = vadd.f32 %v3500_v62, %v3475_v29 }
 0x231   : > { %v659_v18 = vmax.f32 %v658_v12, %v656_v17 }
 0x233   : > { %v660_v22 = vsub.f32 %v644_v63, %v659_v18  ;;  %v663_v23 = vsub.f32 %v648_v59, %v659_v18  ;;  %v666_v26 = vsub.f32 %v652_v0, %v659_v18  ;;  %v669_v27 = vsub.f32 %v656_v17, %v659_v18 }
 0x235   : > { %v661_v32 = vmul.f32 1.442695, %v660_v22  ;;  %v664_v36 = vmul.f32 1.442695, %v663_v23  ;;  %v667_v41 = vmul.f32 1.442695, %v666_v26 }
 0x236   : > { %v670_v44 = vmul.f32 1.442695, %v669_v27 }
 0x237   : > { %2761 = vpow2.f32 %v661_v32 }
 0x238   : > { %2763 = vpow2.f32 %v664_v36 }
 0x239   : > { %2765 = vpow2.f32 %v667_v41 }
 0x23a   : > { %2767 = vpow2.f32 %v670_v44 }
 0x241   : > { %v2762_v47 = vpop.eup %2761 }
 0x242   : > { %v2764_v54 = vpop.eup %2763  ;;  %v675_v56 = vmul.f32 %v2762_v47, %v621_v46 }
 0x243   : > { %v2766_v59 = vpop.eup %2765  ;;  %v672_v63 = vadd.f32 %v2764_v54, %v2762_v47  ;;  %v676_v0 = vmul.f32 %v2764_v54, %v627_v53  ;;  %v3622_v54 = vld [vmem:[%s3861_s6] ss:$0 sm:$0xff] }
 0x244   : > { %v2768_v1 = vpop.eup %2767  ;;  %v678_v43 = vmul.f32 %v2766_v59, %v633_v61 }
 0x245   : > { %v673_v12 = vadd.f32 %v2766_v59, %v672_v63  ;;  %v677_v17 = vadd.f32 %v676_v0, %v675_v56  ;;  %v680_v23 = vmul.f32 %v2768_v1, %v639_v8 }
 0x247   : > { %v674_v18 = vadd.f32 %v2768_v1, %v673_v12  ;;  %v679_v22 = vadd.f32 %v678_v43, %v677_v17 }
 0x249   : > { %v681_v50 = vadd.f32 %v680_v23, %v679_v22  ;;  %2769 = vrcp.f32 %v674_v18 }
 0x253   : > { %v2770_v26 = vpop.eup %2769 }
 0x254   : > { %v683_v27 = vmul.f32 %v2770_v26, %v681_v50 }
 0x256   : > { %v684_v32 = vadd.f32 %v683_v27, %v3485_v38 }
 0x258   : > { %v1890_v55 = vmul.f32 -1.442695, %v684_v32 }
 0x25a   : > { %2771 = vpow2.f32 %v1890_v55 }
 0x264   : > { %v2772_v36 = vpop.eup %2771 }
 0x265   : > { %v688_v41 = vadd.f32 1.0, %v2772_v36 }
 0x267   : > { %2773 = vrcp.f32 %v688_v41 }
 0x26d   : > { %v842_v47 = vpop.f32.mrb[8].mxu1 }
 0x26e   : > { %v2162_v53 = vpop.f32.mrb[9].mxu1  ;;  %v3628_v17 = vadd.f32 %v3482_v35, %v842_v47 }
 0x26f   : > { %v1901_v53 = vld [vmem:[%s3318_s15 + $0x10] sm:$0xff] }
 0x271   : > { %v3567_v62 = vpop.eup %2773 }
 0x272   : > { %2126 = vmatmul.mubr.f32.vlgmr.msra.gmra.mrb[2].mxu0 %v3567_v62  ;;  %773 = vst [vmem:[%s772_s17] sm:$0xff] %v3567_v62  ;;  %s1896_s17 = sshll.u32 %s862_s14, 3  ;;  %s1900_s14 = sshll.u32 %s1085_s22, 3 }
 0x273   : > { %2445 = vmatpush1.bf16.msra.mxu0 %v3342_v11  ;;  %930 = vmatprep.mubr.f32.mxu0 %v3051_v9  ;;  %s864_s12 = scalar_lea.vmem [#allocation2], %s1896_s17  ;;  %s1087_s17 = scalar_lea.vmem [#allocation2], %s1900_s14 }
 0x274   : > { %2447 = vmatprep.subr.bf16.mxu0 %v3346_v15 }
 0x277   : > { %2449 = vmatpush1.bf16.msra.mxu0 %v3352_v20 }
 0x278   : > { %2451 = vmatprep.subr.bf16.mxu0 %v3356_v24 }
 0x279   : > { %v851_v38 = vld [vmem:[%s850_s7] sm:$0xff] }
 0x27a   : > { %v858_v44 = vld [vmem:[%s857_s19] sm:$0xff]  ;;  %s1168_s19 = sadd.s32 4294967291, %s3379_s9 }
 0x27b   : > { %2453 = vmatpush1.bf16.msra.mxu0 %v3362_v31  ;;  %v865_v46 = vld [vmem:[%s864_s12] sm:$0xff]  ;;  %s1163_s12 = sand.u32 15, %s3920_s23  ;;  %p1169_p2 = scmp.gt.s32.totalorder %s1168_s19, 0 }
 0x27c   : > { %2455 = vmatprep.subr.bf16.mxu0 %v3366_v33  ;;  %s1902_s18 = sshll.u32 %s1163_s12, 3  ;;  %s1472_s12 = sand.u32 15, %s3924_s16 }
 0x27d   : > { %s3922_s19 = smov (!%p1169_p2, %s1168_s19), 0  ;;  %s1165_s22 = scalar_lea.vmem [#allocation2], %s1902_s18 }
 0x27e   : > { %s1171_s1 = sand.u32 15, %s3922_s19  ;;  %s1477_s19 = sadd.s32 4294967292, %s3379_s9 }
 0x27f   : > { %2457 = vmatpush1.bf16.msra.mxu0 %v3372_v40  ;;  %s1903_s23 = sshll.u32 %s1171_s1, 3  ;;  %p1478_p12 = scmp.gt.s32.totalorder %s1477_s19, 0 }
 0x280   : > { %2459 = vmatprep.subr.bf16.mxu0 %v3376_v42  ;;  %s1173_s14 = scalar_lea.vmem [#allocation2], %s1903_s23  ;;  %s1909_s18 = sshll.u32 %s1472_s12, 3 }
 0x281   : > { %s3926_s19 = smov (!%p1478_p12, %s1477_s19), 0 }
 0x282   : > { %s1480_s1 = sand.u32 15, %s3926_s19 }
 0x283   : > { %2461 = vmatpush1.bf16.msra.mxu0 %v3385_v49  ;;  %s1910_s23 = sshll.u32 %s1480_s1, 3 }
 0x284   : > { %2463 = vmatprep.subr.bf16.mxu0 %v3390_v51  ;;  %s1482_s16 = scalar_lea.vmem [#allocation2], %s1910_s23 }
 0x287   : > { %2465 = vmatpush1.bf16.msra.mxu0 %v3401_v58 }
 0x288   : > { %2467 = vmatprep.subr.bf16.mxu0 %v3405_v60 }
 0x28b   : > { %2469 = vmatpush1.bf16.msra.mxu0 %v3420_v3 }
 0x28c   : > { %2471 = vmatprep.subr.bf16.mxu0 %v3425_v7 }
 0x28f   : > { %2473 = vmatpush1.bf16.msra.mxu0 %v3435_v16 }
 0x290   : > { %2498 = vmatprep.subr.bf16.mxu0 %v3049_v4 }
 0x292   : > { %931 = vmatmul.mubr.f32.vlgmr.msra.gmra.mrb[4].mxu0 %v3567_v62 }
 0x293   : > { %936 = vmatprep.mubr.f32.mxu0 %v3051_v9  ;;  %2500 = vmatpush3.bf16.msra.mxu0 %v3340_v10 }
 0x294   : > { %2501 = vmatprep.subr.bf16.mxu0 %v3049_v4 }
 0x296   : > { %937 = vmatmul.mubr.f32.gmra.mrb[6].mxu0 %v851_v38 }
 0x297   : > { %942 = vmatprep.mubr.f32.mxu0 %v3051_v9  ;;  %2503 = vmatpush3.bf16.msra.mxu0 %v3350_v19 }
 0x298   : > { %2504 = vmatprep.subr.bf16.mxu0 %v3049_v4 }
 0x29a   : > { %943 = vmatmul.mubr.f32.gmra.mrb[8].mxu0 %v858_v44 }
 0x29b   : > { %948 = vmatprep.mubr.f32.mxu0 %v3051_v9  ;;  %2506 = vmatpush3.bf16.msra.mxu0 %v3360_v30 }
 0x29c   : > { %2507 = vmatprep.subr.bf16.mxu0 %v3049_v4 }
 0x29e   : > { %949 = vmatmul.mubr.f32.gmra.mrb[10].mxu0 %v865_v46 }
 0x29f   : > { %2509 = vmatpush3.bf16.msra.mxu0 %v3370_v39  ;;  %2230 = vmatprep.mubr.msk.f32.mxu0 %vm3050_vm0, %v3051_v9 }
 0x2a0   : > { %2510 = vmatprep.subr.bf16.mxu0 %v3049_v4 }
 0x2a3   : > { %2512 = vmatpush3.bf16.msra.mxu0 %v3383_v48 }
 0x2a4   : > { %2513 = vmatprep.subr.bf16.mxu0 %v3049_v4 }
 0x2a7   : > { %2515 = vmatpush3.bf16.msra.mxu0 %v3399_v57 }
 0x2a8   : > { %2516 = vmatprep.subr.bf16.mxu0 %v3049_v4 }
 0x2ab   : > { %2518 = vmatpush3.bf16.msra.mxu0 %v3418_v2 }
 0x2ac   : > { %2519 = vmatprep.subr.bf16.mxu0 %v3049_v4 }
 0x2af   : > { %2521 = vmatpush3.bf16.msra.mxu0 %v3433_v14 }
 0x2b0   : > { %2554 = vmatprep.subr.bf16.mxu0 %v3049_v4 }
 0x2b2   : > { %2231 = vmatmul.mubr.f32.vlgmr.msra.gmra.mrb[12].mxu0 %v1901_v53 }
 0x2b3   : > { %2556 = vmatpush3.bf16.msra.mxu0 %v3503_v6  ;;  %2265 = vmatprep.mubr.msk.f32.mxu0 %vm3050_vm0, %v3051_v9 }
 0x2b4   : > { %2557 = vmatprep.subr.bf16.mxu0 %v3049_v4 }
 0x2b7   : > { %2559 = vmatpush3.bf16.msra.mxu0 %v3507_v13 }
 0x2b8   : > { %2560 = vmatprep.subr.bf16.mxu0 %v3049_v4 }
 0x2bb   : > { %2562 = vmatpush3.bf16.msra.mxu0 %v3511_v21 }
 0x2bc   : > { %2563 = vmatprep.subr.bf16.mxu0 %v3049_v4 }
 0x2bf   : > { %2565 = vmatpush3.bf16.msra.mxu0 %v3515_v25 }
 0x2c0   : > { %2566 = vmatprep.subr.bf16.mxu0 %v3049_v4 }
 0x2c3   : > { %2568 = vmatpush3.bf16.msra.mxu0 %v3519_v28 }
 0x2c4   : > { %2569 = vmatprep.subr.bf16.mxu0 %v3049_v4 }
 0x2c7   : > { %2571 = vmatpush3.bf16.msra.mxu0 %v3523_v37 }
 0x2c8   : > { %2572 = vmatprep.subr.bf16.mxu0 %v3049_v4 }
 0x2cb   : > { %2574 = vmatpush3.bf16.msra.mxu0 %v3526_v45 }
 0x2cc   : > { %2575 = vmatprep.subr.bf16.mxu0 %v3049_v4 }
 0x2cf   : > { %2577 = vmatpush3.bf16.msra.mxu0 %v3530_v52 }
 0x2d0   : > { %2603 = vmatprep.subr.bf16.mxu0 %v3336_v5 }
 0x345   : > { %v757_v56 = vpop.f32.mrb[2].mxu0 }
 0x346   : > { %v758_v59 = vadd.f32 %v3622_v54, %v757_v56  ;;  %v2127_v61 = vpop.f32.mrb[3].mxu0 }
 0x348   : > { %v761_v63 = vadd.f32 %v3567_v62, %v758_v59 }
 0x34a   : > { %v1891_v0 = vmul.f32 -1.442695, %v761_v63 }
 0x34c   : > { %2775 = vpow2.f32 %v1891_v0 }
 0x356   : > { %v2776_v1 = vpop.eup %2775 }
 0x357   : > { %v765_v8 = vadd.f32 1.0, %v2776_v1 }
 0x359   : > { %2777 = vrcp.f32 %v765_v8 }
 0x363   : > { %v2778_v12 = vpop.eup %2777 }
 0x364   : > { %768 = vst [vmem:[%s3332_s13] sm:$0xff] %v2778_v12 }
 0x365   : > { %v932_v43 = vpop.f32.mrb[4].mxu0 }
 0x366   : > { %v933_v18 = vadd.f32 %v932_v43, %v3477_v34  ;;  %v934_v22 = vpop.f32.mrb[5].mxu0 }
 0x368   : > { %v955_v23 = vmul.f32 %v933_v18, %v3628_v17 }
 0x369   : > { %v938_v50 = vpop.f32.mrb[6].mxu0 }
 0x36a   : > { %v939_v26 = vadd.f32 %v938_v50, %v3477_v34  ;;  %v940_v27 = vpop.f32.mrb[7].mxu0  ;;  %956 = vadd.xlane.f32.xlu0 %v955_v23 }
 0x36b   : > { %v941_v5 = vadd.f32 %v940_v27, %v3475_v29 }
 0x36c   : > { %v959_v32 = vmul.f32 %v939_v26, %v3628_v17 }
 0x36d   : > { %v944_v55 = vpop.f32.mrb[8].mxu0 }
 0x36e   : > { %v945_v36 = vadd.f32 %v944_v55, %v3477_v34  ;;  %v946_v41 = vpop.f32.mrb[9].mxu0  ;;  %960 = vadd.xlane.f32.xlu1 %v959_v32 }
 0x370   : > { %v963_v62 = vmul.f32 %v945_v36, %v3628_v17 }
 0x371   : > { %v950_v38 = vpop.f32.mrb[10].mxu0 }
 0x372   : > { %v951_v44 = vadd.f32 %v950_v38, %v3477_v34  ;;  %v952_v46 = vpop.f32.mrb[11].mxu0  ;;  %964 = vadd.xlane.f32.xlu0 %v963_v62 }
 0x374   : > { %v967_v47 = vmul.f32 %v951_v44, %v3628_v17 }
 0x376   : > { %968 = vadd.xlane.f32.xlu1 %v967_v47  ;;  %v935_v47 = vadd.f32 %v934_v22, %v3475_v29 }
 0x3f7   : > { %v957_v56 = vpop.xlane.xlu0 %956 }
 0x3f8   : > { %v958_v0 = vmul.f32 0.17677669, %v957_v56 }
 0x3fb   : > { %v961_v59 = vpop.xlane.xlu1 %960 }
 0x3fc   : > { %v962_v61 = vmul.f32 0.17677669, %v961_v59 }
 0x3fe   : > { %v971_v8 = vmax.f32 %v958_v0, %v962_v61 }
 0x3ff   : > { %v965_v63 = vpop.xlane.xlu0 %964 }
 0x400   : > { %v966_v1 = vmul.f32 0.17677669, %v965_v63 }
 0x402   : > { %v972_v43 = vmax.f32 %v971_v8, %v966_v1 }
 0x403   : > { %v969_v12 = vpop.xlane.xlu1 %968 }
 0x404   : > { %v970_v18 = vmul.f32 0.17677669, %v969_v12  ;;  %v953_v12 = vadd.f32 %v952_v46, %v3475_v29 }
 0x406   : > { %v973_v23 = vmax.f32 %v972_v43, %v970_v18 }
 0x408   : > { %v974_v50 = vsub.f32 %v958_v0, %v973_v23  ;;  %v977_v26 = vsub.f32 %v962_v61, %v973_v23  ;;  %v980_v32 = vsub.f32 %v966_v1, %v973_v23  ;;  %v983_v55 = vsub.f32 %v970_v18, %v973_v23 }
 0x409   : > { %v947_v61 = vadd.f32 %v946_v41, %v3475_v29 }
 0x40a   : > { %v975_v36 = vmul.f32 1.442695, %v974_v50  ;;  %v978_v62 = vmul.f32 1.442695, %v977_v26  ;;  %v981_v38 = vmul.f32 1.442695, %v980_v32 }
 0x40b   : > { %v984_v44 = vmul.f32 1.442695, %v983_v55 }
 0x40c   : > { %2779 = vpow2.f32 %v975_v36 }
 0x40d   : > { %2781 = vpow2.f32 %v978_v62 }
 0x40e   : > { %2783 = vpow2.f32 %v981_v38 }
 0x40f   : > { %2785 = vpow2.f32 %v984_v44 }
 0x416   : > { %v2780_v53 = vpop.eup %2779 }
 0x417   : > { %v2782_v56 = vpop.eup %2781  ;;  %v989_v59 = vmul.f32 %v2780_v53, %v935_v47 }
 0x418   : > { %v2784_v63 = vpop.eup %2783  ;;  %v986_v0 = vadd.f32 %v2782_v56, %v2780_v53  ;;  %v990_v1 = vmul.f32 %v2782_v56, %v941_v5 }
 0x419   : > { %v2786_v8 = vpop.eup %2785  ;;  %v992_v23 = vmul.f32 %v2784_v63, %v947_v61 }
 0x41a   : > { %v987_v43 = vadd.f32 %v2784_v63, %v986_v0  ;;  %v991_v18 = vadd.f32 %v990_v1, %v989_v59  ;;  %v994_v22 = vmul.f32 %v2786_v8, %v953_v12 }
 0x41c   : > { %v988_v50 = vadd.f32 %v2786_v8, %v987_v43  ;;  %v993_v26 = vadd.f32 %v992_v23, %v991_v18 }
 0x41e   : > { %v995_v32 = vadd.f32 %v994_v22, %v993_v26  ;;  %2787 = vrcp.f32 %v988_v50 }
 0x428   : > { %v2788_v27 = vpop.eup %2787 }
 0x429   : > { %v997_v55 = vmul.f32 %v2788_v27, %v995_v32 }
 0x42b   : > { %v998_v36 = vadd.f32 %v997_v55, %v3628_v17  ;;  %v1908_v55 = vld [vmem:[%s3318_s15 + $0x18] sm:$0xff]  ;;  %s1393_s15 = sadd.s32 3, %s3379_s9 }
 0x42c   : > { %s1394_s10 = sand.u32 15, %s1393_s15 }
 0x42d   : > { %v1897_v62 = vmul.f32 -1.442695, %v998_v36 }
 0x42f   : > { %2789 = vpow2.f32 %v1897_v62 }
 0x439   : > { %v2790_v41 = vpop.eup %2789 }
 0x43a   : > { %v1002_v38 = vadd.f32 1.0, %v2790_v41 }
 0x43c   : > { %2791 = vrcp.f32 %v1002_v38 }
 0x446   : > { %v3666_v46 = vpop.eup %2791 }
 0x447   : > { %2196 = vmatmul.mubr.f32.vlgmr.msra.gmra.mrb[10].mxu1 %v3666_v46  ;;  %1088 = vst [vmem:[%s1087_s17] sm:$0xff] %v3666_v46 }
 0x448   : > { %2525 = vmatpush1.bf16.msra.mxu1 %v3342_v11  ;;  %1239 = vmatprep.mubr.f32.mxu1 %v3051_v9 }
 0x449   : > { %2527 = vmatprep.subr.bf16.mxu1 %v3346_v15 }
 0x44c   : > { %2529 = vmatpush1.bf16.msra.mxu1 %v3352_v20 }
 0x44d   : > { %2531 = vmatprep.subr.bf16.mxu1 %v3356_v24 }
 0x44e   : > { %v1166_v17 = vld [vmem:[%s1165_s22] sm:$0xff]  ;;  %s1474_s22 = scalar_lea.vmem [#allocation2], %s1909_s18  ;;  %s3897_s18 = sld [smem:[#allocation19_spill]] }
 0x44f   : > { %v1167_v44 = vld [vmem:[%s536_s11] sm:$0xff]  ;;  %s1907_s11 = sshll.u32 %s1394_s10, 3 }
 0x450   : > { %2533 = vmatpush1.bf16.msra.mxu1 %v3362_v31  ;;  %s1396_s17 = scalar_lea.vmem [#allocation2], %s1907_s11 }
 0x451   : > { %2535 = vmatprep.subr.bf16.mxu1 %v3366_v33 }
 0x454   : > { %2537 = vmatpush1.bf16.msra.mxu1 %v3372_v40 }
 0x455   : > { %2539 = vmatprep.subr.bf16.mxu1 %v3376_v42 }
 0x458   : > { %2541 = vmatpush1.bf16.msra.mxu1 %v3385_v49 }
 0x459   : > { %2543 = vmatprep.subr.bf16.mxu1 %v3390_v51 }
 0x45c   : > { %2545 = vmatpush1.bf16.msra.mxu1 %v3401_v58 }
 0x45d   : > { %2547 = vmatprep.subr.bf16.mxu1 %v3405_v60 }
 0x460   : > { %2549 = vmatpush1.bf16.msra.mxu1 %v3420_v3 }
 0x461   : > { %2551 = vmatprep.subr.bf16.mxu1 %v3425_v7 }
 0x464   : > { %2553 = vmatpush1.bf16.msra.mxu1 %v3435_v16 }
 0x465   : > { %2578 = vmatprep.subr.bf16.mxu1 %v3049_v4 }
 0x467   : > { %1240 = vmatmul.mubr.f32.vlgmr.msra.gmra.mrb[12].mxu1 %v3666_v46 }
 0x468   : > { %1245 = vmatprep.mubr.f32.mxu1 %v3051_v9  ;;  %2580 = vmatpush3.bf16.msra.mxu1 %v3340_v10  ;;  %v1174_v10 = vld [vmem:[%s1173_s14] sm:$0xff]  ;;  %s1702_s14 = sadd.s32 4, %s3379_s9  ;;  %s1921_s9 = sshll.u32 %s3030_s27, 9 }
 0x469   : > { %2581 = vmatprep.subr.bf16.mxu1 %v3049_v4  ;;  %s1703_s15 = sand.u32 15, %s1702_s14  ;;  %s3803_s1 = scalar_lea.hbm %s3897_s18, %s1921_s9 }
 0x46a   : > { %s1914_s10 = sshll.u32 %s1703_s15, 3  ;;  %s3052_s27 = smov [#allocation11]  }
 0x46b   : > { %1246 = vmatmul.mubr.f32.gmra.mrb[14].mxu1 %v1166_v17  ;;  %s1705_s11 = scalar_lea.vmem [#allocation2], %s1914_s10 }
 0x46c   : > { %1251 = vmatprep.mubr.f32.mxu1 %v3051_v9  ;;  %2583 = vmatpush3.bf16.msra.mxu1 %v3350_v19  ;;  %v1157_v19 = vpop.f32.mrb[12].mxu0 }
 0x46d   : > { %2584 = vmatprep.subr.bf16.mxu1 %v3049_v4  ;;  %v3718_v59 = vadd.f32 %v3482_v35, %v1157_v19 }
 0x46f   : > { %1252 = vmatmul.mubr.f32.gmra.mrb[16].mxu1 %v1167_v44 }
 0x470   : > { %1257 = vmatprep.mubr.f32.mxu1 %v3051_v9  ;;  %2586 = vmatpush3.bf16.msra.mxu1 %v3360_v30  ;;  %v2232_v30 = vpop.f32.mrb[13].mxu0 }
 0x471   : > { %2587 = vmatprep.subr.bf16.mxu1 %v3049_v4 }
 0x473   : > { %1258 = vmatmul.mubr.f32.gmra.mrb[18].mxu1 %v1174_v10 }
 0x474   : > { %2589 = vmatpush3.bf16.msra.mxu1 %v3370_v39  ;;  %2300 = vmatprep.mubr.msk.f32.mxu1 %vm3050_vm0, %v3051_v9 }
 0x475   : > { %2590 = vmatprep.subr.bf16.mxu1 %v3049_v4 }
 0x478   : > { %2592 = vmatpush3.bf16.msra.mxu1 %v3383_v48 }
 0x479   : > { %2593 = vmatprep.subr.bf16.mxu1 %v3049_v4 }
 0x47c   : > { %2595 = vmatpush3.bf16.msra.mxu1 %v3399_v57 }
 0x47d   : > { %2596 = vmatprep.subr.bf16.mxu1 %v3049_v4 }
 0x480   : > { %2598 = vmatpush3.bf16.msra.mxu1 %v3418_v2 }
 0x481   : > { %2599 = vmatprep.subr.bf16.mxu1 %v3049_v4 }
 0x484   : > { %2601 = vmatpush3.bf16.msra.mxu1 %v3433_v14 }
 0x485   : > { %2634 = vmatprep.subr.bf16.mxu1 %v3049_v4 }
 0x487   : > { %2301 = vmatmul.mubr.f32.vlgmr.msra.gmra.mrb[20].mxu1 %v1908_v55 }
 0x488   : > { %2636 = vmatpush3.bf16.msra.mxu1 %v3503_v6  ;;  %2335 = vmatprep.mubr.msk.f32.mxu1 %vm3050_vm0, %v3051_v9 }
 0x489   : > { %2637 = vmatprep.subr.bf16.mxu1 %v3049_v4 }
 0x48c   : > { %2639 = vmatpush3.bf16.msra.mxu1 %v3507_v13 }
 0x48d   : > { %2640 = vmatprep.subr.bf16.mxu1 %v3049_v4 }
 0x490   : > { %2642 = vmatpush3.bf16.msra.mxu1 %v3511_v21 }
 0x491   : > { %2643 = vmatprep.subr.bf16.mxu1 %v3049_v4 }
 0x494   : > { %2645 = vmatpush3.bf16.msra.mxu1 %v3515_v25 }
 0x495   : > { %2646 = vmatprep.subr.bf16.mxu1 %v3049_v4 }
 0x498   : > { %2648 = vmatpush3.bf16.msra.mxu1 %v3519_v28 }
 0x499   : > { %2649 = vmatprep.subr.bf16.mxu1 %v3049_v4 }
 0x49c   : > { %2651 = vmatpush3.bf16.msra.mxu1 %v3523_v37 }
 0x49d   : > { %2652 = vmatprep.subr.bf16.mxu1 %v3049_v4 }
 0x4a0   : > { %2654 = vmatpush3.bf16.msra.mxu1 %v3526_v45 }
 0x4a1   : > { %2655 = vmatprep.subr.bf16.mxu1 %v3049_v4 }
 0x4a4   : > { %2657 = vmatpush3.bf16.msra.mxu1 %v3530_v52 }
 0x51a   : > { %v1071_v39 = vpop.f32.mrb[10].mxu1 }
 0x51b   : > { %v1072_v48 = vadd.f32 %v3622_v54, %v1071_v39  ;;  %v2197_v47 = vpop.f32.mrb[11].mxu1 }
 0x51d   : > { %v1075_v53 = vadd.f32 %v3666_v46, %v1072_v48 }
 0x51f   : > { %v1898_v57 = vmul.f32 -1.442695, %v1075_v53 }
 0x521   : > { %2793 = vpow2.f32 %v1898_v57 }
 0x52b   : > { %v2794_v5 = vpop.eup %2793 }
 0x52c   : > { %v1079_v56 = vadd.f32 1.0, %v2794_v5 }
 0x52e   : > { %2795 = vrcp.f32 %v1079_v56 }
 0x538   : > { %v2796_v2 = vpop.eup %2795 }
 0x539   : > { %1899 = vst [vmem:[%s3332_s13 + $0x8] sm:$0xff] %v2796_v2 }
 0x53a   : > { %v1241_v14 = vpop.f32.mrb[12].mxu1 }
 0x53b   : > { %v1242_v63 = vadd.f32 %v1241_v14, %v3477_v34  ;;  %v1243_v61 = vpop.f32.mrb[13].mxu1 }
 0x53c   : > { %v1244_v4 = vadd.f32 %v1243_v61, %v3475_v29 }
 0x53d   : > { %v1264_v0 = vmul.f32 %v1242_v63, %v3718_v59 }
 0x53e   : > { %v1247_v1 = vpop.f32.mrb[14].mxu1 }
 0x53f   : > { %v1248_v8 = vadd.f32 %v1247_v1, %v3477_v34  ;;  %v1249_v12 = vpop.f32.mrb[15].mxu1  ;;  %1265 = vadd.xlane.f32.xlu0 %v1264_v0 }
 0x540   : > { %v1250_v52 = vadd.f32 %v1249_v12, %v3475_v29 }
 0x541   : > { %v1268_v43 = vmul.f32 %v1248_v8, %v3718_v59 }
 0x542   : > { %v1253_v18 = vpop.f32.mrb[16].mxu1 }
 0x543   : > { %v1254_v23 = vadd.f32 %v1253_v18, %v3477_v34  ;;  %v1255_v50 = vpop.f32.mrb[17].mxu1  ;;  %1269 = vadd.xlane.f32.xlu1 %v1268_v43 }
 0x544   : > { %v1256_v56 = vadd.f32 %v1255_v50, %v3475_v29 }
 0x545   : > { %v1272_v35 = vmul.f32 %v1254_v23, %v3718_v59 }
 0x546   : > { %v1259_v26 = vpop.f32.mrb[18].mxu1 }
 0x547   : > { %v1260_v22 = vadd.f32 %v1259_v26, %v3477_v34  ;;  %v1261_v32 = vpop.f32.mrb[19].mxu1  ;;  %1273 = vadd.xlane.f32.xlu0 %v1272_v35 }
 0x548   : > { %v1262_v0 = vadd.f32 %v1261_v32, %v3475_v29 }
 0x549   : > { %v1276_v27 = vmul.f32 %v1260_v22, %v3718_v59 }
 0x54b   : > { %1277 = vadd.xlane.f32.xlu1 %v1276_v27 }
 0x5cc   : > { %v1266_v6 = vpop.xlane.xlu0 %1265 }
 0x5cd   : > { %v1267_v62 = vmul.f32 0.17677669, %v1266_v6 }
 0x5d0   : > { %v1270_v36 = vpop.xlane.xlu1 %1269 }
 0x5d1   : > { %v1271_v13 = vmul.f32 0.17677669, %v1270_v36 }
 0x5d3   : > { %v1280_v41 = vmax.f32 %v1267_v62, %v1271_v13 }
 0x5d4   : > { %v1274_v21 = vpop.xlane.xlu0 %1273 }
 0x5d5   : > { %v1275_v25 = vmul.f32 0.17677669, %v1274_v21 }
 0x5d7   : > { %v1281_v38 = vmax.f32 %v1280_v41, %v1275_v25 }
 0x5d8   : > { %v1278_v28 = vpop.xlane.xlu1 %1277 }
 0x5d9   : > { %v1279_v46 = vmul.f32 0.17677669, %v1278_v28 }
 0x5db   : > { %v1282_v17 = vmax.f32 %v1281_v38, %v1279_v46 }
 0x5dd   : > { %v1283_v37 = vsub.f32 %v1267_v62, %v1282_v17  ;;  %v1286_v44 = vsub.f32 %v1271_v13, %v1282_v17  ;;  %v1289_v10 = vsub.f32 %v1275_v25, %v1282_v17  ;;  %v1292_v19 = vsub.f32 %v1279_v46, %v1282_v17 }
 0x5df   : > { %v1284_v30 = vmul.f32 1.442695, %v1283_v37  ;;  %v1287_v39 = vmul.f32 1.442695, %v1286_v44  ;;  %v1290_v48 = vmul.f32 1.442695, %v1289_v10 }
 0x5e0   : > { %v1293_v45 = vmul.f32 1.442695, %v1292_v19 }
 0x5e1   : > { %2797 = vpow2.f32 %v1284_v30 }
 0x5e2   : > { %2799 = vpow2.f32 %v1287_v39 }
 0x5e3   : > { %2801 = vpow2.f32 %v1290_v48 }
 0x5e4   : > { %2803 = vpow2.f32 %v1293_v45 }
 0x5eb   : > { %v2798_v47 = vpop.eup %2797 }
 0x5ec   : > { %v2800_v53 = vpop.eup %2799  ;;  %v1298_v57 = vmul.f32 %v2798_v47, %v1244_v4 }
 0x5ed   : > { %v2802_v5 = vpop.eup %2801  ;;  %v1295_v2 = vadd.f32 %v2800_v53, %v2798_v47  ;;  %v1299_v14 = vmul.f32 %v2800_v53, %v1250_v52 }
 0x5ee   : > { %v2804_v63 = vpop.eup %2803  ;;  %v1301_v43 = vmul.f32 %v2802_v5, %v1256_v56 }
 0x5ef   : > { %v1296_v1 = vadd.f32 %v2802_v5, %v1295_v2  ;;  %v1300_v8 = vadd.f32 %v1299_v14, %v1298_v57  ;;  %v1303_v61 = vmul.f32 %v2804_v63, %v1262_v0 }
 0x5f1   : > { %v1297_v18 = vadd.f32 %v2804_v63, %v1296_v1  ;;  %v1302_v23 = vadd.f32 %v1301_v43, %v1300_v8 }
 0x5f3   : > { %v1304_v35 = vadd.f32 %v1303_v61, %v1302_v23  ;;  %2805 = vrcp.f32 %v1297_v18 }
 0x5fd   : > { %v2806_v12 = vpop.eup %2805 }
 0x5fe   : > { %v1306_v26 = vmul.f32 %v2806_v12, %v1304_v35 }
 0x600   : > { %v1307_v22 = vadd.f32 %v1306_v26, %v3718_v59 }
 0x602   : > { %v1904_v27 = vmul.f32 -1.442695, %v1307_v22 }
 0x604   : > { %2807 = vpow2.f32 %v1904_v27 }
 0x60e   : > { %v2808_v50 = vpop.eup %2807 }
 0x60f   : > { %v1311_v55 = vadd.f32 1.0, %v2808_v50 }
 0x611   : > { %2809 = vrcp.f32 %v1311_v55 }
 0x61b   : > { %v2810_v32 = vpop.eup %2809 }
 0x61c   : > { %2266 = vmatmul.mubr.f32.vlgmr.msra.gmra.mrb[14].mxu0 %v2810_v32  ;;  %1397 = vst [vmem:[%s1396_s17] sm:$0xff] %v2810_v32  ;;  %s1722_s17 = sshll.u32 %s3332_s13, 4  ;;  %s3805_s17 = int_to_ptr.vmem [resolvable:$true] %s1722_s17 }
 0x61d   : > { %2605 = vmatpush1.bf16.msra.mxu0 %v3342_v11  ;;  %1548 = vmatprep.mubr.f32.mxu0 %v3051_v9  ;;  %s2948_s23 = scalar_lea.vmem %s3805_s17, 512 }
 0x61e   : > { %2607 = vmatprep.subr.bf16.mxu0 %v3346_v15  ;;  %p2949_p1 = scmp.ne.s32.totalorder %s3805_s17, %s2948_s23 }
 0x620   : > { %p2950_p7 = pnand %p2949_p1, %p3255_p3 }
 0x621   : > { %2609 = vmatpush1.bf16.msra.mxu0 %v3352_v20 }
 0x622   : > { %2611 = vmatprep.subr.bf16.mxu0 %v3356_v24  ;;  %v1466_v24 = vpop.f32.mrb[20].mxu1  ;;  %p2951_p13 = pneg %p2950_p7 }
 0x623   : > { %v1475_v11 = vld [vmem:[%s1474_s22] sm:$0xff]  ;;  %s1708_s22 = scalar_lea.sflag [#allocation5], %s3314_s21 }
 0x624   : > { %v1476_v15 = vld [vmem:[%s850_s7] sm:$0xff] }
 0x625   : > { %2613 = vmatpush1.bf16.msra.mxu0 %v3362_v31  ;;  %v1483_v20 = vld [vmem:[%s1482_s16] sm:$0xff]  ;;  %v2302_v31 = vpop.f32.mrb[21].mxu1  ;;  %s2952_s16 = sshll.u32 %s3052_s27, 4  ;;  %s2953_s16 = int_to_ptr.vmem [resolvable:$false] %s2952_s16 }
 0x626   : > { %2615 = vmatprep.subr.bf16.mxu0 %v3366_v33  ;;  %s2954_s20 = scalar_lea.vmem %s2953_s16, 1024  ;;  %p2955_p6 = scmp.lt.s32.totalorder %s3805_s17, %s2953_s16 }
 0x627   : > { %p2956_p10 = scmp.lt.s32.totalorder %s2954_s20, %s2948_s23 }
 0x629   : > { %2617 = vmatpush1.bf16.msra.mxu0 %v3372_v40  ;;  %p2957_p11 = por %p2956_p10, %p2955_p6 }
 0x62a   : > { %2619 = vmatprep.subr.bf16.mxu0 %v3376_v42 }
 0x62b   : > { %p2958_p5 = pnand %p2957_p11, %p2951_p13 }
 0x62d   : > { %2621 = vmatpush1.bf16.msra.mxu0 %v3385_v49 }
 0x62e   : > { %2623 = vmatprep.subr.bf16.mxu0 %v3390_v51 }
 0x631   : > { %2625 = vmatpush1.bf16.msra.mxu0 %v3401_v58 }
 0x632   : > { %2627 = vmatprep.subr.bf16.mxu0 %v3405_v60 }
 0x635   : > { %2629 = vmatpush1.bf16.msra.mxu0 %v3420_v3 }
 0x636   : > { %2631 = vmatprep.subr.bf16.mxu0 %v3425_v7 }
 0x639   : > { %2633 = vmatpush1.bf16.msra.mxu0 %v3435_v16 }
 0x63c   : > { %1549 = vmatmul.mubr.f32.vlgmr.msra.gmra.mrb[16].mxu0 %v2810_v32 }
 0x63d   : > { %1554 = vmatprep.mubr.f32.mxu0 %v3051_v9 }
 0x640   : > { %1555 = vmatmul.mubr.f32.gmra.mrb[18].mxu0 %v1475_v11 }
 0x641   : > { %1560 = vmatprep.mubr.f32.mxu0 %v3051_v9 }
 0x644   : > { %1561 = vmatmul.mubr.f32.gmra.mrb[20].mxu0 %v1476_v15 }
 0x645   : > { %1566 = vmatprep.mubr.f32.mxu0 %v3051_v9  ;;  %v2833_v9 = vld [vmem:[%s3857_s2] ss:$0 sm:$0xff] }
 0x646   : > { %v3781_v7 = vadd.f32 %v2833_v9, %v1466_v24 }
 0x648   : > { %1567 = vmatmul.mubr.f32.gmra.mrb[22].mxu0 %v1483_v20 }
 0x6ef   : > { %v1380_v33 = vpop.f32.mrb[14].mxu0 }
 0x6f0   : > { %v1381_v40 = vadd.f32 %v3622_v54, %v1380_v33  ;;  %v2267_v42 = vpop.f32.mrb[15].mxu0 }
 0x6f2   : > { %v1384_v49 = vadd.f32 %v2810_v32, %v1381_v40 }
 0x6f4   : > { %v1905_v51 = vmul.f32 -1.442695, %v1384_v49 }
 0x6f6   : > { %2811 = vpow2.f32 %v1905_v51 }
 0x700   : > { %v2812_v58 = vpop.eup %2811 }
 0x701   : > { %v1388_v60 = vadd.f32 1.0, %v2812_v58 }
 0x703   : > { %2813 = vrcp.f32 %v1388_v60 }
 0x70d   : > { %v2814_v3 = vpop.eup %2813 }
 0x70e   : > { %1906 = vst [vmem:[%s3332_s13 + $0x10] sm:$0xff] %v2814_v3 }
 0x70f   : > { %v1550_v16 = vpop.f32.mrb[16].mxu0 }
 0x710   : > { %v1551_v59 = vadd.f32 %v1550_v16, %v3477_v34  ;;  %v1552_v6 = vpop.f32.mrb[17].mxu0 }
 0x711   : > { %v1553_v43 = vadd.f32 %v1552_v6, %v3475_v29 }
 0x712   : > { %v1573_v36 = vmul.f32 %v1551_v59, %v3781_v7 }
 0x713   : > { %v1556_v13 = vpop.f32.mrb[18].mxu0 }
 0x714   : > { %v1557_v21 = vadd.f32 %v1556_v13, %v3477_v34  ;;  %v1558_v62 = vpop.f32.mrb[19].mxu0  ;;  %1574 = vadd.xlane.f32.xlu0 %v1573_v36 }
 0x715   : > { %v1559_v23 = vadd.f32 %v1558_v62, %v3475_v29 }
 0x716   : > { %v1577_v25 = vmul.f32 %v1557_v21, %v3781_v7 }
 0x717   : > { %v1562_v41 = vpop.f32.mrb[20].mxu0 }
 0x718   : > { %v1563_v28 = vadd.f32 %v1562_v41, %v3477_v34  ;;  %v1564_v38 = vpop.f32.mrb[21].mxu0  ;;  %1578 = vadd.xlane.f32.xlu1 %v1577_v25 }
 0x719   : > { %v1565_v26 = vadd.f32 %v1564_v38, %v3475_v29 }
 0x71a   : > { %v1581_v46 = vmul.f32 %v1563_v28, %v3781_v7 }
 0x71b   : > { %v1568_v17 = vpop.f32.mrb[22].mxu0 }
 0x71c   : > { %v1569_v37 = vadd.f32 %v1568_v17, %v3477_v34  ;;  %v1570_v44 = vpop.f32.mrb[23].mxu0  ;;  %1582 = vadd.xlane.f32.xlu0 %v1581_v46 }
 0x71d   : > { %v1571_v55 = vadd.f32 %v1570_v44, %v3475_v29 }
 0x71e   : > { %v1585_v10 = vmul.f32 %v1569_v37, %v3781_v7 }
 0x720   : > { %1586 = vadd.xlane.f32.xlu1 %v1585_v10 }
 0x7a1   : > { %v1575_v19 = vpop.xlane.xlu0 %1574 }
 0x7a2   : > { %v1576_v45 = vmul.f32 0.17677669, %v1575_v19 }
 0x7a5   : > { %v1579_v30 = vpop.xlane.xlu1 %1578 }
 0x7a6   : > { %v1580_v39 = vmul.f32 0.17677669, %v1579_v30 }
 0x7a8   : > { %v1589_v47 = vmax.f32 %v1576_v45, %v1580_v39 }
 0x7a9   : > { %v1583_v48 = vpop.xlane.xlu0 %1582 }
 0x7aa   : > { %v1584_v4 = vmul.f32 0.17677669, %v1583_v48 }
 0x7ac   : > { %v1590_v53 = vmax.f32 %v1589_v47, %v1584_v4 }
 0x7ad   : > { %v1587_v52 = vpop.xlane.xlu1 %1586 }
 0x7ae   : > { %v1588_v57 = vmul.f32 0.17677669, %v1587_v52 }
 0x7b0   : > { %v1591_v5 = vmax.f32 %v1590_v53, %v1588_v57 }
 0x7b2   : > { %v1592_v56 = vsub.f32 %v1576_v45, %v1591_v5  ;;  %v1595_v2 = vsub.f32 %v1580_v39, %v1591_v5  ;;  %v1598_v14 = vsub.f32 %v1584_v4, %v1591_v5  ;;  %v1601_v34 = vsub.f32 %v1588_v57, %v1591_v5 }
 0x7b4   : > { %v1593_v63 = vmul.f32 1.442695, %v1592_v56  ;;  %v1596_v0 = vmul.f32 1.442695, %v1595_v2  ;;  %v1599_v1 = vmul.f32 1.442695, %v1598_v14 }
 0x7b5   : > { %v1602_v8 = vmul.f32 1.442695, %v1601_v34 }
 0x7b6   : > { %2815 = vpow2.f32 %v1593_v63 }
 0x7b7   : > { %2817 = vpow2.f32 %v1596_v0 }
 0x7b8   : > { %2819 = vpow2.f32 %v1599_v1 }
 0x7b9   : > { %2821 = vpow2.f32 %v1602_v8 }
 0x7c0   : > { %v2816_v18 = vpop.eup %2815 }
 0x7c1   : > { %v2818_v61 = vpop.eup %2817  ;;  %v1607_v35 = vmul.f32 %v2816_v18, %v1553_v43 }
 0x7c2   : > { %v2820_v12 = vpop.eup %2819  ;;  %v1604_v22 = vadd.f32 %v2818_v61, %v2816_v18  ;;  %v1608_v27 = vmul.f32 %v2818_v61, %v1559_v23 }
 0x7c3   : > { %v2822_v50 = vpop.eup %2821  ;;  %v1610_v15 = vmul.f32 %v2820_v12, %v1565_v26 }
 0x7c4   : > { %v1605_v32 = vadd.f32 %v2820_v12, %v1604_v22  ;;  %v1609_v11 = vadd.f32 %v1608_v27, %v1607_v35  ;;  %v1612_v31 = vmul.f32 %v2822_v50, %v1571_v55 }
 0x7c6   : > { %v1606_v20 = vadd.f32 %v2822_v50, %v1605_v32  ;;  %v1611_v24 = vadd.f32 %v1610_v15, %v1609_v11 }
 0x7c8   : > { %v1613_v33 = vadd.f32 %v1612_v31, %v1611_v24  ;;  %2823 = vrcp.f32 %v1606_v20 }
 0x7d2   : > { %v2824_v40 = vpop.eup %2823 }
 0x7d3   : > { %v1615_v42 = vmul.f32 %v2824_v40, %v1613_v33 }
 0x7d5   : > { %v1616_v49 = vadd.f32 %v1615_v42, %v3781_v7 }
 0x7d7   : > { %v1911_v51 = vmul.f32 -1.442695, %v1616_v49 }
 0x7d9   : > { %2825 = vpow2.f32 %v1911_v51 }
 0x7e3   : > { %v2826_v58 = vpop.eup %2825 }
 0x7e4   : > { %v1620_v60 = vadd.f32 1.0, %v2826_v58 }
 0x7e6   : > { %2827 = vrcp.f32 %v1620_v60 }
 0x7f0   : > { %v2828_v29 = vpop.eup %2827 }
 0x7f1   : > { %1706 = vst [vmem:[%s1705_s11] sm:$0xff] %v2828_v29  ;;  %2336 = vmatmul.mubr.f32.vlgmr.msra.gmra.mrb[22].mxu1 %v2828_v29 }
 0x8c4   : > { %v1689_v3 = vpop.f32.mrb[22].mxu1 }
 0x8c5   : > { %v1690_v9 = vadd.f32 %v3622_v54, %v1689_v3  ;;  %v2337_v7 = vpop.f32.mrb[23].mxu1 }
 0x8c7   : > { %v1693_v16 = vadd.f32 %v2828_v29, %v1690_v9 }
 0x8c9   : > { %v1912_v59 = vmul.f32 -1.442695, %v1693_v16 }
 0x8cb   : > { %2829 = vpow2.f32 %v1912_v59 }
 0x8d5   : > { %v2830_v6 = vpop.eup %2829 }
 0x8d6   : > { %v1697_v36 = vadd.f32 1.0, %v2830_v6 }
 0x8d8   : > { %2831 = vrcp.f32 %v1697_v36 }
 0x8e2   : > { %v2832_v54 = vpop.eup %2831 }
 0x8e3   : > { %1913 = vst [vmem:[%s3332_s13 + $0x18] sm:$0xff] %v2832_v54 }
 0x8e4   : > { %2961 = shalt.err (!%p2958_p5)
}
 0x8e5   : > { %s2962_s13 = scalar_lea.hbm %s3803_s1, 512  ;;  %s2966_s15 = scalar_lea.hbm %s3897_s18, 1024 }
 0x8e6   : > { %p2963_p9 = scmp.ne.s32.totalorder %s3803_s1, %s2962_s13  ;;  %p2967_p2 = scmp.lt.u32.totalorder %s3803_s1, %s3897_s18 }
 0x8e7   : > { %p2968_p8 = scmp.lt.u32.totalorder %s2966_s15, %s2962_s13  ;;  %p2970_p1 = scmp.lt.u32.totalorder %s2962_s13, %s3803_s1 }
 0x8e8   : > { %p2964_p0 = pnand %p2963_p9, %p3255_p3 }
 0x8e9   : > { %p2969_p12 = por %p2968_p8, %p2967_p2 }
 0x8ea   : > { %p2965_p4 = pneg %p2964_p0 }
 0x8eb   : > { %p2971_p7 = por %p2970_p1, %p2969_p12 }
 0x8ed   : > { %p2972_p13 = pnand %p2971_p7, %p2965_p4 }
 0x8ef   : > { %2975 = shalt.err (!%p2972_p13)
}
 0x8f0   : > { %s3053_s9 = smov 128   ;;  %s3054_s19 = smov 8  }
 0x8f1   : > { %2672 = dma.vmem_to_hbm [thread:$0]  (%p3255_p3), %s3805_s17, 512, %s3803_s1, %s1708_s22, %s3053_s9, %s3053_s9, %s3054_s19  }
 0x8f2 PF: > { %s3898_s12 = sld [smem:[#allocation16_spill]]  ;;  %s3899_s23 = sld [smem:[#allocation17_spill]] }
 0x8f3   : > { %p3901_p10 = scmp.ge.s32.totalorder %s3038_s29, 2 }
 0x8f8   : > { %s1737_s27 = sand.u32 1, %s3898_s12   ;;  %p3900_p6 = scmp.ne.s32.totalorder %s3899_s23, 0 }
 0x8f9   : > { %s1738_s16 = scalar_lea.sflag [#allocation5], %s1737_s27 }
 0x8fa   : > { %p2689_p11 = pnand %p3901_p10, %p3900_p6 }
 0x8fc   : > { %3013 = dma.done.wait (!%p2689_p11), %s1738_s16, 512  }
 0x8fd   : > { %3015 = vsyncadd (!%p2689_p11), %s1738_s16, 4294966784  ;;  %s25_s29 = sadd.s32 1, %s3038_s29   ;;  %s3902_s24 = smov %s3022_s25 }
 0x8fe   : > { %p22_p5 = scmp.ge.s32.totalorder %s25_s29, 4   ;;  %s3903_s25 = smov %s3026_s26 }
 0x8ff   : > { %s3904_s26 = smov %s3264_s8  ;;  %s3905_s27 = smov %s3034_s28 }
 0x900   : > { %s3906_s28 = smov %s3908_s30  ;;  %24 = sbr.rel (!%p22_p5) target bundleno = 11 (0xb), region = 130 }
 0x907   :  { %1743 = vsyncpa [#allocation4], 1 }
 0x908   :  { %1745 = vsyncpa [#allocation4 + $0x1], 1 }
 0x909   :  { %1746 = vsyncpa [#allocation7], 1 }
 0x90a   :  { %1747 = vsyncpa [#allocation10], 1 }
 0x90b   :  { %1748 = vsyncpa [#allocation5], 1 }
 0x90c   :  { %1750 = vsyncpa [#allocation5 + $0x1], 1 }

</bundles_post_ra>
